<compile_context>
chip_gen: v6e
topology: v6e:2x2x1
jax: 0.10.0
libtpu: 0.0.40
codegen_flags: <defaults>
</compile_context>

<pallas_src>
import functools

import jax
import jax.numpy as jnp
from jax import lax
from jax.experimental import pallas as pl
from jax.experimental.pallas import tpu as pltpu


def _round_up(x, m):
    return ((x + m - 1) // m) * m


def _lrelu(v):
    return jnp.where(v >= 0, v, 0.2 * v)


# ----------------------------------------------------------------------------
# Fused implicit-GEMM conv kernel: (ROWS, 16*C_in) @ (16*C_in, C_out) + BN stats
# ----------------------------------------------------------------------------
def _gemm_bn_kernel(p_ref, w_ref, y_ref, st_ref, *, valid_rows):
    """One row tile of the K-packed im2col GEMM.

    p_ref : (ROWS, K)  bf16   im2col panel rows (K = 16 * C_in, lane axis)
    w_ref : (K, CO)    bf16   packed conv weights
    y_ref : (ROWS, CO) bf16   raw conv output rows
    st_ref: (2, CO)    f32    per-tile BN partial stats [sum ; sum of squares]
    """
    rows, co = y_ref.shape

    # Single MXU matmul with the full contraction depth: bf16 operands,
    # f32 accumulation inside the MXU (no per-offset VPU accumulate chain).
    acc = jnp.dot(p_ref[...], w_ref[...], preferred_element_type=jnp.float32)
    y_ref[...] = acc.astype(y_ref.dtype)

    # Training-mode BatchNorm partial statistics.  Rows past `valid_rows` are
    # zero-padded im2col rows (bias-free conv => zero outputs), but the
    # in-kernel iota mask keeps the stats exact without relying on that.
    row_ids = pl.program_id(0) * rows + lax.broadcasted_iota(
        jnp.int32, (rows, 1), 0)
    am = jnp.where(row_ids < valid_rows, acc, 0.0)
    s1 = jnp.sum(am, axis=0, keepdims=True)          # (1, CO) sum
    s2 = jnp.sum(am * am, axis=0, keepdims=True)     # (1, CO) sum of squares
    # Single (2, CO) store instead of two 1-row slice stores.
    sel = lax.broadcasted_iota(jnp.int32, (2, co), 0)
    st_ref[...] = jnp.where(sel == 0, s1, s2)


def _pick_rows(m, k, co):
    """Row-tile size: multiple of 16 (bf16 sublane packing), bounded so the
    bf16 input tile + bf16 output tile stay within a ~4 MiB budget (keeps the
    double-buffered VMEM footprint small and the f32 result slab modest),
    grown toward 2048 rows when K/C_out are small."""
    budget = 4 * 1024 * 1024
    rows = budget // (2 * (k + co))
    rows = max(256, min(2048, (rows // 256) * 256))
    rows = min(rows, _round_up(m, 16))
    return int(rows)


def _conv4x4_s2(x_nhwc, w_oihw):
    """Conv2d(kernel=4, stride=2, padding=1, bias=False) on an NHWC input via
    a K-packed implicit GEMM (one MXU matmul per row tile).

    Returns:
      y     : (N, OH, OW, C_out) bf16 raw conv output (no BN / activation)
      stats : (2, C_out) f32 per-channel [sum, sum_of_squares] over N*OH*OW.
    """
    N, H, W, C = map(int, x_nhwc.shape)
    assert H % 2 == 0 and W % 2 == 0, "4x4/s2/p1 conv expects even H, W"
    CO = int(w_oihw.shape[0])
    OH, OW = H // 2, W // 2
    M = N * OH * OW
    K = 16 * C

    # Wrapper-side K-packed im2col: pad=1, one strided slice per (dh, dw)
    # kernel offset, concatenated along channels.  Under jit this fuses with
    # the preceding BN-apply / LeakyReLU into a single pass, and the panel's
    # last dim (K = 16*C) is the lane axis of the MXU operand.
    xb = x_nhwc.astype(jnp.bfloat16)
    xp = jnp.pad(xb, ((0, 0), (1, 1), (1, 1), (0, 0)))
    cols = [xp[:, dh:dh + 2 * OH:2, dw:dw + 2 * OW:2, :]
            for dh in range(4) for dw in range(4)]
    panel = jnp.concatenate(cols, axis=-1).reshape(M, K)

    ROWS = _pick_rows(M, K, CO)
    n_tiles = -(-M // ROWS)
    M_pad = n_tiles * ROWS
    if M_pad != M:
        panel = jnp.pad(panel, ((0, M_pad - M), (0, 0)))   # zero rows

    # Weights: (C_out, C_in, 4, 4) -> (16*C_in, C_out); K index = (dh*4+dw)*C+c
    wk = jnp.transpose(w_oihw, (2, 3, 1, 0)).reshape(K, CO).astype(jnp.bfloat16)

    kernel = functools.partial(_gemm_bn_kernel, valid_rows=M)

    # Explicit VMEM budget from the (double-buffered) block sizes, capped by
    # the physical VMEM when the runtime exposes it (v7x has only 64 MiB).
    blk_bytes = 2 * (ROWS * K * 2 + K * CO * 2 + ROWS * CO * 2 + 2 * CO * 4)
    vmem_limit = max(32 * 1024 * 1024, blk_bytes + (4 << 20))
    try:
        vmem_limit = min(vmem_limit,
                         int(pltpu.get_tpu_info().vmem_capacity_bytes) // 2)
    except Exception:
        vmem_limit = min(vmem_limit, 32 * 1024 * 1024)

    y, st = pl.pallas_call(
        kernel,
        grid=(n_tiles,),                 # flat parallel axis (batch folded in)
        in_specs=[pl.BlockSpec((ROWS, K), lambda i: (i, 0)),
                  pl.BlockSpec((K, CO), lambda i: (0, 0))],
        out_specs=[pl.BlockSpec((ROWS, CO), lambda i: (i, 0)),
                   pl.BlockSpec((None, 2, CO), lambda i: (i, 0, 0))],
        out_shape=[jax.ShapeDtypeStruct((M_pad, CO), jnp.bfloat16),
                   jax.ShapeDtypeStruct((n_tiles, 2, CO), jnp.float32)],
        compiler_params=pltpu.CompilerParams(
            dimension_semantics=("parallel",),
            vmem_limit_bytes=int(vmem_limit)),
    )(panel, wk)

    y = y[:M].reshape(N, OH, OW, CO)
    stats = jnp.sum(st, axis=0)                      # (2, CO) f32
    return y, stats


def _bn_scale_shift(stats, count, gamma, beta, eps=1e-5):
    """Training-mode BatchNorm (biased batch variance) as per-channel affine.
    Variance as E[x^2]-E[x]^2 in f32 (fine for near-zero-mean conv outputs)."""
    mean = stats[0] / count
    var = stats[1] / count - mean * mean
    scale = gamma * lax.rsqrt(var + eps)
    shift = beta - mean * scale
    return scale, shift


# ----------------------------------------------------------------------------
# Full discriminator forward
# ----------------------------------------------------------------------------
def dcgan_discriminator_forward(x_nchw, params):
    x = jnp.transpose(x_nchw, (0, 2, 3, 1))          # NHWC end-to-end
    N = x.shape[0]

    # Block 1: Conv(c_in -> ch) + LReLU (no BN on the first block).
    y1, _ = _conv4x4_s2(x, params["w1"])

    # Block 2: Conv(ch -> 2ch) + BN(train) + LReLU.  Block 1's LReLU and the
    # next im2col build fuse into one XLA pass under jit.
    h1 = _lrelu(y1.astype(jnp.float32))
    y2, st2 = _conv4x4_s2(h1, params["w2"])
    cnt2 = float(y2.shape[0] * y2.shape[1] * y2.shape[2])
    sc2, sh2 = _bn_scale_shift(st2, cnt2, params["g2"], params["b2"])

    # Block 3: Conv(2ch -> 4ch) + BN(train) + LReLU.
    h2 = _lrelu(y2.astype(jnp.float32) * sc2 + sh2)
    y3, st3 = _conv4x4_s2(h2, params["w3"])
    cnt3 = float(y3.shape[0] * y3.shape[1] * y3.shape[2])
    sc3, sh3 = _bn_scale_shift(st3, cnt3, params["g3"], params["b3"])
    h3 = _lrelu(y3.astype(jnp.float32) * sc3 + sh3)

    # ChannelsProjectLayer: Conv((3,5), s1, p0) -> 1 channel on a tiny map.
    # Kept as a wrapper einsum (a pallas_call here is pure launch overhead).
    wp = params["wp"]
    kh, kw = int(wp.shape[2]), int(wp.shape[3])
    wpr = jnp.transpose(wp, (2, 3, 1, 0)).astype(jnp.float32)   # (kh, kw, C, 1)
    OHp_ = h3.shape[1] - kh + 1
    OWp_ = h3.shape[2] - kw + 1
    out = jnp.zeros((N, OHp_, OWp_, 1), jnp.float32)
    for dh in range(kh):
        for dw in range(kw):
            out = out + jnp.einsum("nhwc,co->nhwo",
                                   h3[:, dh:dh + OHp_, dw:dw + OWp_, :],
                                   wpr[dh, dw])
    return out.reshape(-1)                            # .view(-1)


# ----------------------------------------------------------------------------
# Pure-JAX reference (float32, lax.conv) for a correctness cross-check
# ----------------------------------------------------------------------------
def _reference_forward(x, params):
    def conv(v, w, stride, pad):
        return lax.conv_general_dilated(
            v, w, (stride, stride), [(pad, pad), (pad, pad)],
            dimension_numbers=("NCHW", "OIHW", "NCHW"))

    def lrelu(v):
        return jnp.where(v >= 0, v, 0.2 * v)

    def bn(v, g, b):
        mean = v.mean(axis=(0, 2, 3), keepdims=True)
        var = ((v - mean) ** 2).mean(axis=(0, 2, 3), keepdims=True)
        return ((v - mean) / jnp.sqrt(var + 1e-5)) * g.reshape(1, -1, 1, 1) \
            + b.reshape(1, -1, 1, 1)

    h = lrelu(conv(x, params["w1"], 2, 1))
    h = lrelu(bn(conv(h, params["w2"], 2, 1), params["g2"], params["b2"]))
    h = lrelu(bn(conv(h, params["w3"], 2, 1), params["g3"], params["b3"]))
    return conv(h, params["wp"], 1, 0).reshape(-1)


if __name__ == "__main__":
    # Small deterministic config: c_in=4, c_hidden=8, n_contracting_blocks=3,
    # output_kernel_size=(3,5).  Input 24x40 -> 12x20 -> 6x10 -> 3x5 -> 1x1.
    N, C_IN, H, W = 2, 4, 24, 40
    C_HIDDEN = 8

    key = jax.random.PRNGKey(0)
    keys = jax.random.split(key, 9)
    params = {
        "w1": 0.02 * jax.random.normal(keys[0], (C_HIDDEN, C_IN, 4, 4), jnp.float32),
        "w2": 0.02 * jax.random.normal(keys[1], (2 * C_HIDDEN, C_HIDDEN, 4, 4), jnp.float32),
        "g2": 1.0 + 0.1 * jax.random.normal(keys[2], (2 * C_HIDDEN,), jnp.float32),
        "b2": 0.1 * jax.random.normal(keys[3], (2 * C_HIDDEN,), jnp.float32),
        "w3": 0.02 * jax.random.normal(keys[4], (4 * C_HIDDEN, 2 * C_HIDDEN, 4, 4), jnp.float32),
        "g3": 1.0 + 0.1 * jax.random.normal(keys[5], (4 * C_HIDDEN,), jnp.float32),
        "b3": 0.1 * jax.random.normal(keys[6], (4 * C_HIDDEN,), jnp.float32),
        "wp": 0.02 * jax.random.normal(keys[7], (1, 4 * C_HIDDEN, 3, 5), jnp.float32),
    }
    x = jax.random.normal(keys[8], (N, C_IN, H, W), jnp.float32)

    fwd = jax.jit(dcgan_discriminator_forward)
    out = jax.block_until_ready(fwd(x, params))
    assert out.shape == (N,), out.shape

    ref = jax.block_until_ready(_reference_forward(x, params))
    # bf16 MXU operands / bf16-stored activations vs a pure-f32 reference.
    assert bool(jnp.allclose(out, ref, atol=3e-2, rtol=3e-2)), (out, ref)

    print("KERNEL_OK")
</pallas_src>

<mosaic_0001>
module attributes {stable_mosaic.version = 11 : i64} {
  func.func @_gemm_bn_kernel(%arg0: i32, %arg1: memref<480x64xbf16, #tpu.memory_space<vmem>>, %arg2: memref<64x8xbf16, #tpu.memory_space<vmem>>, %arg3: memref<480x8xbf16, #tpu.memory_space<vmem>>, %arg4: memref<1x2x8xf32, #tpu.memory_space<vmem>>) attributes {dimension_semantics = [#tpu.dimension_semantics<parallel>], iteration_bounds = array<i64: 1>, scalar_prefetch = 0 : i64, scratch_operands = 0 : i64, tpu.core_type = #tpu.core_type<tc>, window_params = [{transform_indices = @transform_0, window_bounds = array<i64: 480, 64>}, {pipeline_mode = #tpu.pipeline_mode<synchronous>, transform_indices = @transform_1, window_bounds = array<i64: 64, 8>}, {transform_indices = @transform_2, window_bounds = array<i64: 480, 8>}, {transform_indices = @transform_3, window_bounds = array<i64: 1, 2, 8>}]} {
    %c0 = arith.constant 0 : index
    %c0_0 = arith.constant 0 : index
    %0 = vector.load %arg1[%c0, %c0_0] : memref<480x64xbf16, #tpu.memory_space<vmem>>, vector<480x64xbf16>
    %c0_1 = arith.constant 0 : index
    %c0_2 = arith.constant 0 : index
    %1 = vector.load %arg2[%c0_1, %c0_2] : memref<64x8xbf16, #tpu.memory_space<vmem>>, vector<64x8xbf16>
    %cst = arith.constant dense<0.000000e+00> : vector<480x8xf32>
    %2 = tpu.matmul %0, %1, %cst {dimension_numbers = #tpu.dot_dimension_numbers<[1], [0], [0], [1], [0, 0, 1, 1], [], []>} : vector<480x64xbf16>, vector<64x8xbf16>, vector<480x8xf32> -> vector<480x8xf32>
    %3 = arith.truncf %2 : vector<480x8xf32> to vector<480x8xbf16>
    %c0_3 = arith.constant 0 : index
    %c0_4 = arith.constant 0 : index
    %4 = vector.load %arg3[%c0_3, %c0_4] : memref<480x8xbf16, #tpu.memory_space<vmem>>, vector<480x8xbf16>
    tpu.vector_store %arg3[%c0_3, %c0_4], %3 {strides = array<i32>} : memref<480x8xbf16, #tpu.memory_space<vmem>>, vector<480x8xbf16>,
    %c480_i32 = arith.constant 480 : i32
    %5 = arith.muli %arg0, %c480_i32 : i32
    %6 = tpu.iota {dimensions = array<i32: 0>} : vector<480x1xi32>
    %7 = vector.broadcast %5 : i32 to vector<480x1xi32>
    %8 = arith.addi %7, %6 : vector<480x1xi32>
    %c480_i32_5 = arith.constant 480 : i32
    %9 = vector.broadcast %c480_i32_5 : i32 to vector<480x1xi32>
    %10 = arith.cmpi slt, %8, %9 : vector<480x1xi32>
    %cst_6 = arith.constant 0.000000e+00 : f32
    %11 = vector.shape_cast %10 : vector<480x1xi1> to vector<480x1xi1>
    %12 = vector.broadcast %11 : vector<480x1xi1> to vector<480x8xi1>
    %13 = vector.broadcast %cst_6 : f32 to vector<480x8xf32>
    %14 = arith.select %12, %2, %13 : vector<480x8xi1>, vector<480x8xf32>
    %cst_7 = arith.constant dense<0.000000e+00> : vector<8xf32>
    %15 = vector.multi_reduction <add>, %14, %cst_7 [0] : vector<480x8xf32> to vector<8xf32>
    %16 = vector.shape_cast %15 : vector<8xf32> to vector<1x8xf32>
    %17 = arith.mulf %14, %14 : vector<480x8xf32>
    %cst_8 = arith.constant dense<0.000000e+00> : vector<8xf32>
    %18 = vector.multi_reduction <add>, %17, %cst_8 [0] : vector<480x8xf32> to vector<8xf32>
    %19 = vector.shape_cast %18 : vector<8xf32> to vector<1x8xf32>
    %20 = tpu.iota {dimensions = array<i32: 0>} : vector<2x8xi32>
    %c0_i32 = arith.constant 0 : i32
    %21 = vector.broadcast %c0_i32 : i32 to vector<2x8xi32>
    %22 = arith.cmpi eq, %20, %21 : vector<2x8xi32>
    %23 = vector.shape_cast %16 : vector<1x8xf32> to vector<1x8xf32>
    %24 = vector.broadcast %23 : vector<1x8xf32> to vector<2x8xf32>
    %25 = vector.shape_cast %19 : vector<1x8xf32> to vector<1x8xf32>
    %26 = vector.broadcast %25 : vector<1x8xf32> to vector<2x8xf32>
    %27 = arith.select %22, %24, %26 : vector<2x8xi1>, vector<2x8xf32>
    %c0_9 = arith.constant 0 : index
    %c0_10 = arith.constant 0 : index
    %c0_11 = arith.constant 0 : index
    %28 = vector.load %arg4[%c0_9, %c0_10, %c0_11] : memref<1x2x8xf32, #tpu.memory_space<vmem>>, vector<1x2x8xf32>
    %29 = vector.shape_cast %28 : vector<1x2x8xf32> to vector<2x8xf32>
    %30 = vector.shape_cast %27 : vector<2x8xf32> to vector<1x2x8xf32>
    tpu.vector_store %arg4[%c0_9, %c0_10, %c0_11], %30 {strides = array<i32>} : memref<1x2x8xf32, #tpu.memory_space<vmem>>, vector<1x2x8xf32>,
    return
  }
  func.func @transform_0(%arg0: i32) -> (i32, i32) {
    %c0_i32 = arith.constant 0 : i32
    %c0_i32_0 = arith.constant 0 : i32
    return %arg0, %c0_i32 : i32, i32
  }
  func.func @transform_1(%arg0: i32) -> (i32, i32) {
    %c0_i32 = arith.constant 0 : i32
    %c0_i32_0 = arith.constant 0 : i32
    %c0_i32_1 = arith.constant 0 : i32
    return %c0_i32, %c0_i32_0 : i32, i32
  }
  func.func @transform_2(%arg0: i32) -> (i32, i32) {
    %c0_i32 = arith.constant 0 : i32
    %c0_i32_0 = arith.constant 0 : i32
    return %arg0, %c0_i32 : i32, i32
  }
  func.func @transform_3(%arg0: i32) -> (i32, i32, i32) {
    %c0_i32 = arith.constant 0 : i32
    %c0_i32_0 = arith.constant 0 : i32
    %c0_i32_1 = arith.constant 0 : i32
    return %arg0, %c0_i32, %c0_i32_0 : i32, i32, i32
  }
}

module attributes {stable_mosaic.version = 11 : i64} {
  func.func @_gemm_bn_kernel(%arg0: i32, %arg1: memref<128x128xbf16, #tpu.memory_space<vmem>>, %arg2: memref<128x16xbf16, #tpu.memory_space<vmem>>, %arg3: memref<128x16xbf16, #tpu.memory_space<vmem>>, %arg4: memref<1x2x16xf32, #tpu.memory_space<vmem>>) attributes {dimension_semantics = [#tpu.dimension_semantics<parallel>], iteration_bounds = array<i64: 1>, scalar_prefetch = 0 : i64, scratch_operands = 0 : i64, tpu.core_type = #tpu.core_type<tc>, window_params = [{transform_indices = @transform_0, window_bounds = array<i64: 128, 128>}, {pipeline_mode = #tpu.pipeline_mode<synchronous>, transform_indices = @transform_1, window_bounds = array<i64: 128, 16>}, {transform_indices = @transform_2, window_bounds = array<i64: 128, 16>}, {transform_indices = @transform_3, window_bounds = array<i64: 1, 2, 16>}]} {
    %c0 = arith.constant 0 : index
    %c0_0 = arith.constant 0 : index
    %0 = vector.load %arg1[%c0, %c0_0] : memref<128x128xbf16, #tpu.memory_space<vmem>>, vector<128x128xbf16>
    %c0_1 = arith.constant 0 : index
    %c0_2 = arith.constant 0 : index
    %1 = vector.load %arg2[%c0_1, %c0_2] : memref<128x16xbf16, #tpu.memory_space<vmem>>, vector<128x16xbf16>
    %cst = arith.constant dense<0.000000e+00> : vector<128x16xf32>
    %2 = tpu.matmul %0, %1, %cst {dimension_numbers = #tpu.dot_dimension_numbers<[1], [0], [0], [1], [0, 0, 1, 1], [], []>} : vector<128x128xbf16>, vector<128x16xbf16>, vector<128x16xf32> -> vector<128x16xf32>
    %3 = arith.truncf %2 : vector<128x16xf32> to vector<128x16xbf16>
    %c0_3 = arith.constant 0 : index
    %c0_4 = arith.constant 0 : index
    %4 = vector.load %arg3[%c0_3, %c0_4] : memref<128x16xbf16, #tpu.memory_space<vmem>>, vector<128x16xbf16>
    tpu.vector_store %arg3[%c0_3, %c0_4], %3 {strides = array<i32>} : memref<128x16xbf16, #tpu.memory_space<vmem>>, vector<128x16xbf16>,
    %c128_i32 = arith.constant 128 : i32
    %5 = arith.muli %arg0, %c128_i32 : i32
    %6 = tpu.iota {dimensions = array<i32: 0>} : vector<128x1xi32>
    %7 = vector.broadcast %5 : i32 to vector<128x1xi32>
    %8 = arith.addi %7, %6 : vector<128x1xi32>
    %c120_i32 = arith.constant 120 : i32
    %9 = vector.broadcast %c120_i32 : i32 to vector<128x1xi32>
    %10 = arith.cmpi slt, %8, %9 : vector<128x1xi32>
    %cst_5 = arith.constant 0.000000e+00 : f32
    %11 = vector.shape_cast %10 : vector<128x1xi1> to vector<128x1xi1>
    %12 = vector.broadcast %11 : vector<128x1xi1> to vector<128x16xi1>
    %13 = vector.broadcast %cst_5 : f32 to vector<128x16xf32>
    %14 = arith.select %12, %2, %13 : vector<128x16xi1>, vector<128x16xf32>
    %cst_6 = arith.constant dense<0.000000e+00> : vector<16xf32>
    %15 = vector.multi_reduction <add>, %14, %cst_6 [0] : vector<128x16xf32> to vector<16xf32>
    %16 = vector.shape_cast %15 : vector<16xf32> to vector<1x16xf32>
    %17 = arith.mulf %14, %14 : vector<128x16xf32>
    %cst_7 = arith.constant dense<0.000000e+00> : vector<16xf32>
    %18 = vector.multi_reduction <add>, %17, %cst_7 [0] : vector<128x16xf32> to vector<16xf32>
    %19 = vector.shape_cast %18 : vector<16xf32> to vector<1x16xf32>
    %20 = tpu.iota {dimensions = array<i32: 0>} : vector<2x16xi32>
    %c0_i32 = arith.constant 0 : i32
    %21 = vector.broadcast %c0_i32 : i32 to vector<2x16xi32>
    %22 = arith.cmpi eq, %20, %21 : vector<2x16xi32>
    %23 = vector.shape_cast %16 : vector<1x16xf32> to vector<1x16xf32>
    %24 = vector.broadcast %23 : vector<1x16xf32> to vector<2x16xf32>
    %25 = vector.shape_cast %19 : vector<1x16xf32> to vector<1x16xf32>
    %26 = vector.broadcast %25 : vector<1x16xf32> to vector<2x16xf32>
    %27 = arith.select %22, %24, %26 : vector<2x16xi1>, vector<2x16xf32>
    %c0_8 = arith.constant 0 : index
    %c0_9 = arith.constant 0 : index
    %c0_10 = arith.constant 0 : index
    %28 = vector.load %arg4[%c0_8, %c0_9, %c0_10] : memref<1x2x16xf32, #tpu.memory_space<vmem>>, vector<1x2x16xf32>
    %29 = vector.shape_cast %28 : vector<1x2x16xf32> to vector<2x16xf32>
    %30 = vector.shape_cast %27 : vector<2x16xf32> to vector<1x2x16xf32>
    tpu.vector_store %arg4[%c0_8, %c0_9, %c0_10], %30 {strides = array<i32>} : memref<1x2x16xf32, #tpu.memory_space<vmem>>, vector<1x2x16xf32>,
    return
  }
  func.func @transform_0(%arg0: i32) -> (i32, i32) {
    %c0_i32 = arith.constant 0 : i32
    %c0_i32_0 = arith.constant 0 : i32
    return %arg0, %c0_i32 : i32, i32
  }
  func.func @transform_1(%arg0: i32) -> (i32, i32) {
    %c0_i32 = arith.constant 0 : i32
    %c0_i32_0 = arith.constant 0 : i32
    %c0_i32_1 = arith.constant 0 : i32
    return %c0_i32, %c0_i32_0 : i32, i32
  }
  func.func @transform_2(%arg0: i32) -> (i32, i32) {
    %c0_i32 = arith.constant 0 : i32
    %c0_i32_0 = arith.constant 0 : i32
    return %arg0, %c0_i32 : i32, i32
  }
  func.func @transform_3(%arg0: i32) -> (i32, i32, i32) {
    %c0_i32 = arith.constant 0 : i32
    %c0_i32_0 = arith.constant 0 : i32
    %c0_i32_1 = arith.constant 0 : i32
    return %arg0, %c0_i32, %c0_i32_0 : i32, i32, i32
  }
}

module attributes {stable_mosaic.version = 11 : i64} {
  func.func @_gemm_bn_kernel(%arg0: i32, %arg1: memref<32x256xbf16, #tpu.memory_space<vmem>>, %arg2: memref<256x32xbf16, #tpu.memory_space<vmem>>, %arg3: memref<32x32xbf16, #tpu.memory_space<vmem>>, %arg4: memref<1x2x32xf32, #tpu.memory_space<vmem>>) attributes {dimension_semantics = [#tpu.dimension_semantics<parallel>], iteration_bounds = array<i64: 1>, scalar_prefetch = 0 : i64, scratch_operands = 0 : i64, tpu.core_type = #tpu.core_type<tc>, window_params = [{transform_indices = @transform_0, window_bounds = array<i64: 32, 256>}, {pipeline_mode = #tpu.pipeline_mode<synchronous>, transform_indices = @transform_1, window_bounds = array<i64: 256, 32>}, {transform_indices = @transform_2, window_bounds = array<i64: 32, 32>}, {transform_indices = @transform_3, window_bounds = array<i64: 1, 2, 32>}]} {
    %c0 = arith.constant 0 : index
    %c0_0 = arith.constant 0 : index
    %0 = vector.load %arg1[%c0, %c0_0] : memref<32x256xbf16, #tpu.memory_space<vmem>>, vector<32x256xbf16>
    %c0_1 = arith.constant 0 : index
    %c0_2 = arith.constant 0 : index
    %1 = vector.load %arg2[%c0_1, %c0_2] : memref<256x32xbf16, #tpu.memory_space<vmem>>, vector<256x32xbf16>
    %cst = arith.constant dense<0.000000e+00> : vector<32x32xf32>
    %2 = tpu.matmul %0, %1, %cst {dimension_numbers = #tpu.dot_dimension_numbers<[1], [0], [0], [1], [0, 0, 1, 1], [], []>} : vector<32x256xbf16>, vector<256x32xbf16>, vector<32x32xf32> -> vector<32x32xf32>
    %3 = arith.truncf %2 : vector<32x32xf32> to vector<32x32xbf16>
    %c0_3 = arith.constant 0 : index
    %c0_4 = arith.constant 0 : index
    %4 = vector.load %arg3[%c0_3, %c0_4] : memref<32x32xbf16, #tpu.memory_space<vmem>>, vector<32x32xbf16>
    tpu.vector_store %arg3[%c0_3, %c0_4], %3 {strides = array<i32>} : memref<32x32xbf16, #tpu.memory_space<vmem>>, vector<32x32xbf16>,
    %c32_i32 = arith.constant 32 : i32
    %5 = arith.muli %arg0, %c32_i32 : i32
    %6 = tpu.iota {dimensions = array<i32: 0>} : vector<32x1xi32>
    %7 = vector.broadcast %5 : i32 to vector<32x1xi32>
    %8 = arith.addi %7, %6 : vector<32x1xi32>
    %c30_i32 = arith.constant 30 : i32
    %9 = vector.broadcast %c30_i32 : i32 to vector<32x1xi32>
    %10 = arith.cmpi slt, %8, %9 : vector<32x1xi32>
    %cst_5 = arith.constant 0.000000e+00 : f32
    %11 = vector.shape_cast %10 : vector<32x1xi1> to vector<32x1xi1>
    %12 = vector.broadcast %11 : vector<32x1xi1> to vector<32x32xi1>
    %13 = vector.broadcast %cst_5 : f32 to vector<32x32xf32>
    %14 = arith.select %12, %2, %13 : vector<32x32xi1>, vector<32x32xf32>
    %cst_6 = arith.constant dense<0.000000e+00> : vector<32xf32>
    %15 = vector.multi_reduction <add>, %14, %cst_6 [0] : vector<32x32xf32> to vector<32xf32>
    %16 = vector.shape_cast %15 : vector<32xf32> to vector<1x32xf32>
    %17 = arith.mulf %14, %14 : vector<32x32xf32>
    %cst_7 = arith.constant dense<0.000000e+00> : vector<32xf32>
    %18 = vector.multi_reduction <add>, %17, %cst_7 [0] : vector<32x32xf32> to vector<32xf32>
    %19 = vector.shape_cast %18 : vector<32xf32> to vector<1x32xf32>
    %20 = tpu.iota {dimensions = array<i32: 0>} : vector<2x32xi32>
    %c0_i32 = arith.constant 0 : i32
    %21 = vector.broadcast %c0_i32 : i32 to vector<2x32xi32>
    %22 = arith.cmpi eq, %20, %21 : vector<2x32xi32>
    %23 = vector.shape_cast %16 : vector<1x32xf32> to vector<1x32xf32>
    %24 = vector.broadcast %23 : vector<1x32xf32> to vector<2x32xf32>
    %25 = vector.shape_cast %19 : vector<1x32xf32> to vector<1x32xf32>
    %26 = vector.broadcast %25 : vector<1x32xf32> to vector<2x32xf32>
    %27 = arith.select %22, %24, %26 : vector<2x32xi1>, vector<2x32xf32>
    %c0_8 = arith.constant 0 : index
    %c0_9 = arith.constant 0 : index
    %c0_10 = arith.constant 0 : index
    %28 = vector.load %arg4[%c0_8, %c0_9, %c0_10] : memref<1x2x32xf32, #tpu.memory_space<vmem>>, vector<1x2x32xf32>
    %29 = vector.shape_cast %28 : vector<1x2x32xf32> to vector<2x32xf32>
    %30 = vector.shape_cast %27 : vector<2x32xf32> to vector<1x2x32xf32>
    tpu.vector_store %arg4[%c0_8, %c0_9, %c0_10], %30 {strides = array<i32>} : memref<1x2x32xf32, #tpu.memory_space<vmem>>, vector<1x2x32xf32>,
    return
  }
  func.func @transform_0(%arg0: i32) -> (i32, i32) {
    %c0_i32 = arith.constant 0 : i32
    %c0_i32_0 = arith.constant 0 : i32
    return %arg0, %c0_i32 : i32, i32
  }
  func.func @transform_1(%arg0: i32) -> (i32, i32) {
    %c0_i32 = arith.constant 0 : i32
    %c0_i32_0 = arith.constant 0 : i32
    %c0_i32_1 = arith.constant 0 : i32
    return %c0_i32, %c0_i32_0 : i32, i32
  }
  func.func @transform_2(%arg0: i32) -> (i32, i32) {
    %c0_i32 = arith.constant 0 : i32
    %c0_i32_0 = arith.constant 0 : i32
    return %arg0, %c0_i32 : i32, i32
  }
  func.func @transform_3(%arg0: i32) -> (i32, i32, i32) {
    %c0_i32 = arith.constant 0 : i32
    %c0_i32_0 = arith.constant 0 : i32
    %c0_i32_1 = arith.constant 0 : i32
    return %arg0, %c0_i32, %c0_i32_0 : i32, i32, i32
  }
}

</mosaic_0001>

<bundles_post_ra>
// kernel: dcgan_discriminator_forward.3
= control target key start
LH: loop header
LB: loop body
LE: loop exit
PB: predicated region body
PF: predicated region fallthrough
CT: control target
= control target key end

     0   :  { %vm257_vm0 = vcmask 523264   ;;  %s2681_s0 = inlined_call_operand.vmem [shape: bf16[480,64], index: 0, kind: input, shape index: {}]   ;;  %s2682_s1 = inlined_call_operand.vmem [shape: bf16[64,8], index: 1, kind: input, shape index: {}]   ;;  %s2683_s2 = inlined_call_operand.vmem [shape: bf16[480,8], index: 2, kind: output, shape index: {0}]   ;;  %s2684_s3 = inlined_call_operand.hbm [shape: f32[1,2,8], index: 3, kind: output, shape index: {1}]  }
   0x1   :  { %v1913_v0 = vld [vmem:[%s2682_s1 + $0x18] sm:$0xff]   ;;  %v1914_v1 = vld [vmem:[%s2682_s1 + $0x10] sm:$0xff]   ;;  %v1915_v2 = vld [vmem:[%s2682_s1 + $0x8] sm:$0xff]  }
   0x2   :  { %1836 = vmatprep.subr.bf16.mxu0 %v1913_v0  ;;  %1904 = vmatprep.subr.bf16.mxu1 %v1913_v0  ;;  %v1917_v3 = vld [vmem:[%s2681_s0] sm:$0xff]   ;;  %v1918_v5 = vld [vmem:[%s2681_s0 + $0x8] sm:$0xff]   ;;  %v1919_v6 = vld [vmem:[%s2681_s0 + $0x10] sm:$0xff]  }
   0x3   :  { %1837 = vmatpush3.bf16.msra.mxu0 %v1913_v0  ;;  %1908 = vmatpush3.bf16.msra.mxu1 %v1913_v0  ;;  %v1916_v4 = vld [vmem:[%s2682_s1] sm:$0xff]   ;;  %v1920_v7 = vld [vmem:[%s2681_s0 + $0x18] sm:$0xff]   ;;  %v1934_v9 = vld [vmem:[%s2681_s0 + $0x88] sm:$0xff]  }
   0x4   :  { %1838 = vmatprep.subr.bf16.mxu0 %v1914_v1  ;;  %1905 = vmatprep.subr.bf16.mxu1 %v1914_v1  ;;  %v1933_v8 = vld [vmem:[%s2681_s0 + $0x80] sm:$0xff]   ;;  %v1935_v10 = vld [vmem:[%s2681_s0 + $0x90] sm:$0xff]   ;;  %v1936_v12 = vld [vmem:[%s2681_s0 + $0x98] sm:$0xff]  }
   0x5   :  { %1844 = vmatprep.mubr.msk.bf16.mxu0 %vm257_vm0, %v1917_v3  ;;  %1876 = vmatprep.mubr.msk.bf16.mxu1 %vm257_vm0, %v1933_v8  ;;  %v1921_v11 = vld [vmem:[%s2681_s0 + $0x20] sm:$0xff]   ;;  %v1922_v14 = vld [vmem:[%s2681_s0 + $0x28] sm:$0xff]   ;;  %v1923_v15 = vld [vmem:[%s2681_s0 + $0x30] sm:$0xff]  }
   0x6   :  { %v1937_v13 = vld [vmem:[%s2681_s0 + $0xa0] sm:$0xff]  }
   0x7   :  { %1839 = vmatpush3.bf16.msra.mxu0 %v1914_v1  ;;  %1909 = vmatpush3.bf16.msra.mxu1 %v1914_v1 }
   0x8   :  { %1840 = vmatprep.subr.bf16.mxu0 %v1915_v2  ;;  %1906 = vmatprep.subr.bf16.mxu1 %v1915_v2 }
   0xb   :  { %1841 = vmatpush3.bf16.msra.mxu0 %v1915_v2  ;;  %1910 = vmatpush3.bf16.msra.mxu1 %v1915_v2 }
   0xc   :  { %1842 = vmatprep.subr.bf16.mxu0 %v1916_v4  ;;  %1907 = vmatprep.subr.bf16.mxu1 %v1916_v4 }
   0xf   :  { %1843 = vmatpush3.bf16.msra.mxu0 %v1916_v4  ;;  %1911 = vmatpush3.bf16.msra.mxu1 %v1916_v4 }
  0x12   :  { %1845 = vmatmul.mubr.msk.bf16.vlgmr.msra.gmra.mxu0 %vm257_vm0, %v1918_v5  ;;  %1877 = vmatmul.mubr.msk.bf16.vlgmr.msra.gmra.mxu1 %vm257_vm0, %v1934_v9 }
  0x13   :  { %1848 = vmatprep.mubr.msk.bf16.mxu0 %vm257_vm0, %v1919_v6  ;;  %1880 = vmatprep.mubr.msk.bf16.mxu1 %vm257_vm0, %v1935_v10 }
  0x1a   :  { %1849 = vmatmul.mubr.msk.bf16.gmra.mxu0 %vm257_vm0, %v1920_v7  ;;  %1881 = vmatmul.mubr.msk.bf16.gmra.mxu1 %vm257_vm0, %v1936_v12 }
  0x1b   :  { %1852 = vmatprep.mubr.msk.bf16.mxu0 %vm257_vm0, %v1921_v11  ;;  %1884 = vmatprep.mubr.msk.bf16.mxu1 %vm257_vm0, %v1937_v13 }
  0x22   :  { %1853 = vmatmul.mubr.msk.bf16.gmra.mxu0 %vm257_vm0, %v1922_v14 }
  0x23   :  { %9 = vsyncpa [#allocation3], 0  ;;  %1856 = vmatprep.mubr.msk.bf16.mxu0 %vm257_vm0, %v1923_v15  ;;  %v1938_v16 = vld [vmem:[%s2681_s0 + $0xa8] sm:$0xff]   ;;  %v1939_v17 = vld [vmem:[%s2681_s0 + $0xb0] sm:$0xff]   ;;  %vm861_vm1 = vcmask 60416   ;;  %vm1285_vm2 = vcmask 64512  }
  0x24   :  { %v1924_v18 = vld [vmem:[%s2681_s0 + $0x38] sm:$0xff]   ;;  %v1925_v19 = vld [vmem:[%s2681_s0 + $0x40] sm:$0xff]   ;;  %1885 = vmatmul.mubr.msk.bf16.gmra.mxu1 %vm257_vm0, %v1938_v16  ;;  %v1926_v22 = vld [vmem:[%s2681_s0 + $0x48] sm:$0xff]   ;;  %vm1598_vm4 = vcmask 58368  }
  0x25   :  { %1888 = vmatprep.mubr.msk.bf16.mxu1 %vm257_vm0, %v1939_v17  ;;  %v1940_v20 = vld [vmem:[%s2681_s0 + $0xb8] sm:$0xff]   ;;  %v1941_v21 = vld [vmem:[%s2681_s0 + $0xc0] sm:$0xff]   ;;  %v1927_v23 = vld [vmem:[%s2681_s0 + $0x50] sm:$0xff]  }
  0x26   :  { %v1942_v24 = vld [vmem:[%s2681_s0 + $0xc8] sm:$0xff]   ;;  %v1943_v25 = vld [vmem:[%s2681_s0 + $0xd0] sm:$0xff]   ;;  %v1928_v26 = vld [vmem:[%s2681_s0 + $0x58] sm:$0xff]  }
  0x27   :  { %v1929_v27 = vld [vmem:[%s2681_s0 + $0x60] sm:$0xff]   ;;  %v1944_v28 = vld [vmem:[%s2681_s0 + $0xd8] sm:$0xff]   ;;  %v1930_v30 = vld [vmem:[%s2681_s0 + $0x68] sm:$0xff]  }
  0x28   :  { %v1945_v29 = vld [vmem:[%s2681_s0 + $0xe0] sm:$0xff]   ;;  %v1931_v31 = vld [vmem:[%s2681_s0 + $0x70] sm:$0xff]   ;;  %v1946_v32 = vld [vmem:[%s2681_s0 + $0xe8] sm:$0xff]  }
  0x29   :  { %v1932_v33 = vld [vmem:[%s2681_s0 + $0x78] sm:$0xff]  }
  0x2a   :  { %1857 = vmatmul.mubr.msk.bf16.gmra.mxu0 %vm257_vm0, %v1924_v18 }
  0x2b   :  { %1860 = vmatprep.mubr.msk.bf16.mxu0 %vm257_vm0, %v1925_v19 }
  0x2c   :  { %1889 = vmatmul.mubr.msk.bf16.gmra.mxu1 %vm257_vm0, %v1940_v20 }
  0x2d   :  { %1892 = vmatprep.mubr.msk.bf16.mxu1 %vm257_vm0, %v1941_v21 }
  0x32   :  { %1861 = vmatmul.mubr.msk.bf16.gmra.mxu0 %vm257_vm0, %v1926_v22 }
  0x33   :  { %1864 = vmatprep.mubr.msk.bf16.mxu0 %vm257_vm0, %v1927_v23 }
  0x34   :  { %1893 = vmatmul.mubr.msk.bf16.gmra.mxu1 %vm257_vm0, %v1942_v24 }
  0x35   :  { %1896 = vmatprep.mubr.msk.bf16.mxu1 %vm257_vm0, %v1943_v25 }
  0x3a   :  { %1865 = vmatmul.mubr.msk.bf16.gmra.mxu0 %vm257_vm0, %v1928_v26 }
  0x3b   :  { %1868 = vmatprep.mubr.msk.bf16.mxu0 %vm257_vm0, %v1929_v27 }
  0x3c   :  { %1897 = vmatmul.mubr.msk.bf16.gmra.mxu1 %vm257_vm0, %v1944_v28 }
  0x3d   :  { %1900 = vmatprep.mubr.msk.bf16.mxu1 %vm257_vm0, %v1945_v29 }
  0x42   :  { %1869 = vmatmul.mubr.msk.bf16.gmra.mxu0 %vm257_vm0, %v1930_v30 }
  0x43   :  { %1872 = vmatprep.mubr.msk.bf16.mxu0 %vm257_vm0, %v1931_v31 }
  0x44   :  { %1901 = vmatmul.mubr.msk.bf16.gmra.mxu1 %vm257_vm0, %v1946_v32 }
  0x4a   :  { %1873 = vmatmul.mubr.msk.bf16.gmra.mxu0 %vm257_vm0, %v1932_v33 }
  0xd2   :  { %v1846_v34 = vpop.f32.mrf.mxu0  ;;  %v2130_v41 = vpop.f32.mrf.mxu1 }
  0xd3   :  { %v1744_v35 = vpack.c.bf16 %v1846_v34, %v1846_v34  ;;  %v1413_v42 = vmul.f32 %v1846_v34, %v1846_v34  ;;  %v1776_v44 = vpack.c.bf16 %v2130_v41, %v2130_v41  ;;  %v1289_v50 = vsel %vm1285_vm2, %v1846_v34, 0.0 }
  0xd4   :  { %v382_v36 = vpop.f32.mrf.mxu0  ;;  %v2140_v49 = vpop.f32.mrf.mxu1 }
  0xd5   :  { %864 = vst.msk [vmem:[%s2683_s2 + $0x8] sm:$0xf] %vm861_vm1, %v1744_v35  ;;  %v1742_v37 = vpack.c.bf16 %v382_v36, %v382_v36  ;;  %v1411_v39 = vmul.f32 %v382_v36, %v382_v36  ;;  %v1286_v45 = vsel %vm1285_vm2, %v382_v36, 0.0  ;;  %896 = vst.msk [vmem:[%s2683_s2 + $0x88] sm:$0xf] %vm861_vm1, %v1776_v44  ;;  %v1774_v53 = vpack.c.bf16 %v2140_v49, %v2140_v49 }
  0xd6   :  { %v1847_v38 = vpop.f32.mrf.mxu0  ;;  %v2155_v58 = vpop.f32.mrf.mxu1  ;;  %v1474_v63 = vsel %vm1285_vm2, %v1413_v42, 0.0 }
  0xd7   :  { %862 = vst.msk [vmem:[%s2683_s2] sm:$0xf] %vm861_vm1, %v1742_v37  ;;  %v1745_v40 = vpack.c.bf16 %v1847_v38, %v1847_v38  ;;  %v1471_v54 = vsel %vm1285_vm2, %v1411_v39, 0.0  ;;  %v1414_v55 = vmul.f32 %v1847_v38, %v1847_v38  ;;  %894 = vst.msk [vmem:[%s2683_s2 + $0x80] sm:$0xf] %vm861_vm1, %v1774_v53  ;;  %v1777_v62 = vpack.c.bf16 %v2155_v58, %v2155_v58 }
  0xd8   :  { %v385_v43 = vpop.f32.mrf.mxu0  ;;  %v1291_v0 = vsel %vm1285_vm2, %v1847_v38, 0.0  ;;  %v2169_v3 = vpop.f32.mrf.mxu1 }
  0xd9   :  { %865 = vst.msk [vmem:[%s2683_s2 + $0xc] sm:$0xf] %vm861_vm1, %v1745_v40  ;;  %v1743_v46 = vpack.c.bf16 %v385_v43, %v385_v43  ;;  %v1287_v47 = vsel %vm1285_vm2, %v385_v43, 0.0  ;;  %v1412_v48 = vmul.f32 %v385_v43, %v385_v43  ;;  %897 = vst.msk [vmem:[%s2683_s2 + $0x8c] sm:$0xf] %vm861_vm1, %v1777_v62  ;;  %v1476_v7 = vsel %vm1285_vm2, %v1414_v55, 0.0 }
  0xda   :  { %v1288_v51 = vadd.f32 %v1287_v47, %v1286_v45  ;;  %v1850_v52 = vpop.f32.mrf.mxu0  ;;  %v2181_v10 = vpop.f32.mrf.mxu1  ;;  %v1775_v15 = vpack.c.bf16 %v2169_v3, %v2169_v3 }
  0xdb   :  { %863 = vst.msk [vmem:[%s2683_s2 + $0x4] sm:$0xf] %vm861_vm1, %v1743_v46  ;;  %v1472_v56 = vsel %vm1285_vm2, %v1412_v48, 0.0  ;;  %v1748_v57 = vpack.c.bf16 %v1850_v52, %v1850_v52  ;;  %v1417_v11 = vmul.f32 %v1850_v52, %v1850_v52  ;;  %v1297_v24 = vsel %vm1285_vm2, %v1850_v52, 0.0 }
  0xdc   :  { %v1290_v59 = vadd.f32 %v1289_v50, %v1288_v51  ;;  %v1473_v60 = vadd.f32 %v1472_v56, %v1471_v54  ;;  %v398_v61 = vpop.f32.mrf.mxu0  ;;  %v2191_v20 = vpop.f32.mrf.mxu1  ;;  %895 = vst.msk [vmem:[%s2683_s2 + $0x84] sm:$0xf] %vm861_vm1, %v1775_v15  ;;  %v1780_v32 = vpack.c.bf16 %v2181_v10, %v2181_v10 }
  0xdd   :  { %868 = vst.msk [vmem:[%s2683_s2 + $0x18] sm:$0xf] %vm861_vm1, %v1748_v57  ;;  %v1746_v1 = vpack.c.bf16 %v398_v61, %v398_v61  ;;  %v1415_v2 = vmul.f32 %v398_v61, %v398_v61  ;;  %v1293_v8 = vsel %vm1285_vm2, %v398_v61, 0.0  ;;  %v1482_v33 = vsel %vm1285_vm2, %v1417_v11, 0.0 }
  0xde   :  { %v1475_v4 = vadd.f32 %v1474_v63, %v1473_v60  ;;  %v1292_v5 = vadd.f32 %v1291_v0, %v1290_v59  ;;  %v1851_v6 = vpop.f32.mrf.mxu0  ;;  %v2203_v28 = vpop.f32.mrf.mxu1  ;;  %900 = vst.msk [vmem:[%s2683_s2 + $0x98] sm:$0xf] %vm861_vm1, %v1780_v32  ;;  %v1778_v51 = vpack.c.bf16 %v2191_v20, %v2191_v20 }
  0xdf   :  { %866 = vst.msk [vmem:[%s2683_s2 + $0x10] sm:$0xf] %vm861_vm1, %v1746_v1  ;;  %v1749_v9 = vpack.c.bf16 %v1851_v6, %v1851_v6  ;;  %v1478_v16 = vsel %vm1285_vm2, %v1415_v2, 0.0  ;;  %v1418_v25 = vmul.f32 %v1851_v6, %v1851_v6  ;;  %v1299_v34 = vsel %vm1285_vm2, %v1851_v6, 0.0 }
  0xe0   :  { %v1294_v12 = vadd.f32 %v1293_v8, %v1292_v5  ;;  %v1477_v13 = vadd.f32 %v1476_v7, %v1475_v4  ;;  %v401_v14 = vpop.f32.mrf.mxu0  ;;  %v2213_v37 = vpop.f32.mrf.mxu1  ;;  %898 = vst.msk [vmem:[%s2683_s2 + $0x90] sm:$0xf] %vm861_vm1, %v1778_v51  ;;  %v1781_v6 = vpack.c.bf16 %v2203_v28, %v2203_v28 }
  0xe1   :  { %869 = vst.msk [vmem:[%s2683_s2 + $0x1c] sm:$0xf] %vm861_vm1, %v1749_v9  ;;  %v1747_v17 = vpack.c.bf16 %v401_v14, %v401_v14  ;;  %v1295_v18 = vsel %vm1285_vm2, %v401_v14, 0.0  ;;  %v1416_v19 = vmul.f32 %v401_v14, %v401_v14  ;;  %v1484_v42 = vsel %vm1285_vm2, %v1418_v25, 0.0 }
  0xe2   :  { %v1479_v21 = vadd.f32 %v1478_v16, %v1477_v13  ;;  %v1296_v22 = vadd.f32 %v1295_v18, %v1294_v12  ;;  %v1854_v23 = vpop.f32.mrf.mxu0  ;;  %901 = vst.msk [vmem:[%s2683_s2 + $0x9c] sm:$0xf] %vm861_vm1, %v1781_v6  ;;  %v1779_v25 = vpack.c.bf16 %v2213_v37, %v2213_v37 }
  0xe3   :  { %867 = vst.msk [vmem:[%s2683_s2 + $0x14] sm:$0xf] %vm861_vm1, %v1747_v17  ;;  %v1480_v26 = vsel %vm1285_vm2, %v1416_v19, 0.0  ;;  %v1752_v27 = vpack.c.bf16 %v1854_v23, %v1854_v23  ;;  %v1421_v46 = vmul.f32 %v1854_v23, %v1854_v23  ;;  %v1305_v61 = vsel %vm1285_vm2, %v1854_v23, 0.0 }
  0xe4   :  { %v1298_v29 = vadd.f32 %v1297_v24, %v1296_v22  ;;  %v1481_v30 = vadd.f32 %v1480_v26, %v1479_v21  ;;  %v414_v31 = vpop.f32.mrf.mxu0  ;;  %v2225_v45 = vpop.f32.mrf.mxu1  ;;  %899 = vst.msk [vmem:[%s2683_s2 + $0x94] sm:$0xf] %vm861_vm1, %v1779_v25 }
  0xe5   :  { %872 = vst.msk [vmem:[%s2683_s2 + $0x28] sm:$0xf] %vm861_vm1, %v1752_v27  ;;  %v1750_v35 = vpack.c.bf16 %v414_v31, %v414_v31  ;;  %v1419_v36 = vmul.f32 %v414_v31, %v414_v31  ;;  %v1301_v43 = vsel %vm1285_vm2, %v414_v31, 0.0  ;;  %v1490_v7 = vsel %vm1285_vm2, %v1421_v46, 0.0 }
  0xe6   :  { %v1483_v38 = vadd.f32 %v1482_v33, %v1481_v30  ;;  %v1300_v39 = vadd.f32 %v1299_v34, %v1298_v29  ;;  %v1855_v40 = vpop.f32.mrf.mxu0  ;;  %v2235_v56 = vpop.f32.mrf.mxu1  ;;  %v1784_v46 = vpack.c.bf16 %v2225_v45, %v2225_v45 }
  0xe7   :  { %870 = vst.msk [vmem:[%s2683_s2 + $0x20] sm:$0xf] %vm861_vm1, %v1750_v35  ;;  %v1753_v44 = vpack.c.bf16 %v1855_v40, %v1855_v40  ;;  %v1486_v52 = vsel %vm1285_vm2, %v1419_v36, 0.0  ;;  %v1422_v62 = vmul.f32 %v1855_v40, %v1855_v40  ;;  %v1307_v8 = vsel %vm1285_vm2, %v1855_v40, 0.0 }
  0xe8   :  { %v1302_v47 = vadd.f32 %v1301_v43, %v1300_v39  ;;  %v1485_v48 = vadd.f32 %v1484_v42, %v1483_v38  ;;  %v417_v50 = vpop.f32.mrf.mxu0  ;;  %v2247_v1 = vpop.f32.mrf.mxu1  ;;  %904 = vst.msk [vmem:[%s2683_s2 + $0xa8] sm:$0xf] %vm861_vm1, %v1784_v46 }
  0xe9   :  { %873 = vst.msk [vmem:[%s2683_s2 + $0x2c] sm:$0xf] %vm861_vm1, %v1753_v44  ;;  %v1751_v53 = vpack.c.bf16 %v417_v50, %v417_v50  ;;  %v1303_v54 = vsel %vm1285_vm2, %v417_v50, 0.0  ;;  %v1420_v55 = vmul.f32 %v417_v50, %v417_v50  ;;  %v1492_v16 = vsel %vm1285_vm2, %v1422_v62, 0.0 }
  0xea   :  { %v1487_v57 = vadd.f32 %v1486_v52, %v1485_v48  ;;  %v1304_v59 = vadd.f32 %v1303_v54, %v1302_v47  ;;  %v1858_v60 = vpop.f32.mrf.mxu0  ;;  %v2257_v12 = vpop.f32.mrf.mxu1  ;;  %v1785_v25 = vpack.c.bf16 %v2247_v1, %v2247_v1 }
  0xeb   :  { %871 = vst.msk [vmem:[%s2683_s2 + $0x24] sm:$0xf] %vm861_vm1, %v1751_v53  ;;  %v1488_v63 = vsel %vm1285_vm2, %v1420_v55, 0.0  ;;  %v1756_v0 = vpack.c.bf16 %v1858_v60, %v1858_v60  ;;  %v1425_v21 = vmul.f32 %v1858_v60, %v1858_v60  ;;  %v1313_v35 = vsel %vm1285_vm2, %v1858_v60, 0.0 }
  0xec   :  { %v1306_v2 = vadd.f32 %v1305_v61, %v1304_v59  ;;  %v1489_v4 = vadd.f32 %v1488_v63, %v1487_v57  ;;  %v430_v5 = vpop.f32.mrf.mxu0  ;;  %v2269_v19 = vpop.f32.mrf.mxu1  ;;  %905 = vst.msk [vmem:[%s2683_s2 + $0xac] sm:$0xf] %vm861_vm1, %v1785_v25 }
  0xed   :  { %876 = vst.msk [vmem:[%s2683_s2 + $0x38] sm:$0xf] %vm861_vm1, %v1756_v0  ;;  %v1754_v9 = vpack.c.bf16 %v430_v5, %v430_v5  ;;  %v1423_v11 = vmul.f32 %v430_v5, %v430_v5  ;;  %v1309_v17 = vsel %vm1285_vm2, %v430_v5, 0.0  ;;  %v1498_v47 = vsel %vm1285_vm2, %v1425_v21, 0.0 }
  0xee   :  { %v1491_v13 = vadd.f32 %v1490_v7, %v1489_v4  ;;  %v1308_v14 = vadd.f32 %v1307_v8, %v1306_v2  ;;  %v1859_v15 = vpop.f32.mrf.mxu0  ;;  %v2279_v31 = vpop.f32.mrf.mxu1  ;;  %v1782_v4 = vpack.c.bf16 %v2235_v56, %v2235_v56 }
  0xef   :  { %874 = vst.msk [vmem:[%s2683_s2 + $0x30] sm:$0xf] %vm861_vm1, %v1754_v9  ;;  %v1757_v18 = vpack.c.bf16 %v1859_v15, %v1859_v15  ;;  %v1494_v26 = vsel %vm1285_vm2, %v1423_v11, 0.0  ;;  %v1426_v36 = vmul.f32 %v1859_v15, %v1859_v15  ;;  %v1315_v48 = vsel %vm1285_vm2, %v1859_v15, 0.0 }
  0xf0   :  { %v1310_v22 = vadd.f32 %v1309_v17, %v1308_v14  ;;  %v1493_v23 = vadd.f32 %v1492_v16, %v1491_v13  ;;  %v433_v24 = vpop.f32.mrf.mxu0  ;;  %v2291_v40 = vpop.f32.mrf.mxu1  ;;  %902 = vst.msk [vmem:[%s2683_s2 + $0xa0] sm:$0xf] %vm861_vm1, %v1782_v4 }
  0xf1   :  { %877 = vst.msk [vmem:[%s2683_s2 + $0x3c] sm:$0xf] %vm861_vm1, %v1757_v18  ;;  %v1755_v27 = vpack.c.bf16 %v433_v24, %v433_v24  ;;  %v1311_v29 = vsel %vm1285_vm2, %v433_v24, 0.0  ;;  %v1424_v30 = vmul.f32 %v433_v24, %v433_v24  ;;  %v1500_v57 = vsel %vm1285_vm2, %v1426_v36, 0.0 }
  0xf2   :  { %v1495_v32 = vadd.f32 %v1494_v26, %v1493_v23  ;;  %v1312_v33 = vadd.f32 %v1311_v29, %v1310_v22  ;;  %v1862_v34 = vpop.f32.mrf.mxu0  ;;  %v2301_v52 = vpop.f32.mrf.mxu1 }
  0xf3   :  { %875 = vst.msk [vmem:[%s2683_s2 + $0x34] sm:$0xf] %vm861_vm1, %v1755_v27  ;;  %v1496_v38 = vsel %vm1285_vm2, %v1424_v30, 0.0  ;;  %v1760_v39 = vpack.c.bf16 %v1862_v34, %v1862_v34  ;;  %v1429_v62 = vmul.f32 %v1862_v34, %v1862_v34  ;;  %v1321_v15 = vsel %vm1285_vm2, %v1862_v34, 0.0 }
  0xf4   :  { %v1314_v42 = vadd.f32 %v1313_v35, %v1312_v33  ;;  %v1497_v43 = vadd.f32 %v1496_v38, %v1495_v32  ;;  %v446_v44 = vpop.f32.mrf.mxu0  ;;  %v2313_v61 = vpop.f32.mrf.mxu1 }
  0xf5   :  { %880 = vst.msk [vmem:[%s2683_s2 + $0x48] sm:$0xf] %vm861_vm1, %v1760_v39  ;;  %v1758_v50 = vpack.c.bf16 %v446_v44, %v446_v44  ;;  %v1427_v51 = vmul.f32 %v446_v44, %v446_v44  ;;  %v1317_v59 = vsel %vm1285_vm2, %v446_v44, 0.0  ;;  %v1506_v26 = vsel %vm1285_vm2, %v1429_v62, 0.0 }
  0xf6   :  { %v1499_v53 = vadd.f32 %v1498_v47, %v1497_v43  ;;  %v1316_v54 = vadd.f32 %v1315_v48, %v1314_v42  ;;  %v1863_v55 = vpop.f32.mrf.mxu0  ;;  %v2323_v9 = vpop.f32.mrf.mxu1  ;;  %v1783_v47 = vpack.c.bf16 %v2257_v12, %v2257_v12 }
  0xf7   :  { %878 = vst.msk [vmem:[%s2683_s2 + $0x40] sm:$0xf] %vm861_vm1, %v1758_v50  ;;  %v1761_v60 = vpack.c.bf16 %v1863_v55, %v1863_v55  ;;  %v1502_v5 = vsel %vm1285_vm2, %v1427_v51, 0.0  ;;  %v1430_v16 = vmul.f32 %v1863_v55, %v1863_v55  ;;  %v1323_v27 = vsel %vm1285_vm2, %v1863_v55, 0.0 }
  0xf8   :  { %v1318_v63 = vadd.f32 %v1317_v59, %v1316_v54  ;;  %v1501_v0 = vadd.f32 %v1500_v57, %v1499_v53  ;;  %v449_v2 = vpop.f32.mrf.mxu0  ;;  %v2335_v21 = vpop.f32.mrf.mxu1  ;;  %903 = vst.msk [vmem:[%s2683_s2 + $0xa4] sm:$0xf] %vm861_vm1, %v1783_v47 }
  0xf9   :  { %881 = vst.msk [vmem:[%s2683_s2 + $0x4c] sm:$0xf] %vm861_vm1, %v1761_v60  ;;  %v1759_v6 = vpack.c.bf16 %v449_v2, %v449_v2  ;;  %v1319_v7 = vsel %vm1285_vm2, %v449_v2, 0.0  ;;  %v1428_v8 = vmul.f32 %v449_v2, %v449_v2  ;;  %v1508_v36 = vsel %vm1285_vm2, %v1430_v16, 0.0 }
  0xfa   :  { %v1503_v11 = vadd.f32 %v1502_v5, %v1501_v0  ;;  %v1320_v13 = vadd.f32 %v1319_v7, %v1318_v63  ;;  %v1866_v14 = vpop.f32.mrf.mxu0  ;;  %v2349_v35 = vpop.f32.mrf.mxu1 }
  0xfb   :  { %879 = vst.msk [vmem:[%s2683_s2 + $0x44] sm:$0xf] %vm861_vm1, %v1759_v6  ;;  %v1504_v17 = vsel %vm1285_vm2, %v1428_v8, 0.0  ;;  %v1764_v18 = vpack.c.bf16 %v1866_v14, %v1866_v14  ;;  %v1433_v42 = vmul.f32 %v1866_v14, %v1866_v14  ;;  %v1329_v60 = vsel %vm1285_vm2, %v1866_v14, 0.0 }
  0xfc   :  { %v1322_v22 = vadd.f32 %v1321_v15, %v1320_v13  ;;  %v1505_v23 = vadd.f32 %v1504_v17, %v1503_v11  ;;  %v462_v24 = vpop.f32.mrf.mxu0  ;;  %v2369_v59 = vpop.f32.mrf.mxu1  ;;  %v1788_v6 = vpack.c.bf16 %v2269_v19, %v2269_v19 }
  0xfd   :  { %884 = vst.msk [vmem:[%s2683_s2 + $0x58] sm:$0xf] %vm861_vm1, %v1764_v18  ;;  %v1762_v29 = vpack.c.bf16 %v462_v24, %v462_v24  ;;  %v1431_v30 = vmul.f32 %v462_v24, %v462_v24  ;;  %v1325_v38 = vsel %vm1285_vm2, %v462_v24, 0.0  ;;  %v1514_v7 = vsel %vm1285_vm2, %v1433_v42, 0.0 }
  0xfe   :  { %v1507_v32 = vadd.f32 %v1506_v26, %v1505_v23  ;;  %v1324_v33 = vadd.f32 %v1323_v27, %v1322_v22  ;;  %v1867_v34 = vpop.f32.mrf.mxu0  ;;  %908 = vst.msk [vmem:[%s2683_s2 + $0xb8] sm:$0xf] %vm861_vm1, %v1788_v6  ;;  %v2389_v17 = vpop.f32.mrf.mxu1 }
  0xff   :  { %882 = vst.msk [vmem:[%s2683_s2 + $0x50] sm:$0xf] %vm861_vm1, %v1762_v29  ;;  %v1765_v39 = vpack.c.bf16 %v1867_v34, %v1867_v34  ;;  %v1510_v48 = vsel %vm1285_vm2, %v1431_v30, 0.0  ;;  %v1434_v62 = vmul.f32 %v1867_v34, %v1867_v34  ;;  %v1331_v8 = vsel %vm1285_vm2, %v1867_v34, 0.0 }
 0x100   :  { %v1326_v43 = vadd.f32 %v1325_v38, %v1324_v33  ;;  %v1509_v44 = vadd.f32 %v1508_v36, %v1507_v32  ;;  %v465_v46 = vpop.f32.mrf.mxu0  ;;  %v1786_v29 = vpack.c.bf16 %v2279_v31, %v2279_v31  ;;  %v2409_v42 = vpop.f32.mrf.mxu1 }
 0x101   :  { %885 = vst.msk [vmem:[%s2683_s2 + $0x5c] sm:$0xf] %vm861_vm1, %v1765_v39  ;;  %v1763_v50 = vpack.c.bf16 %v465_v46, %v465_v46  ;;  %v1327_v51 = vsel %vm1285_vm2, %v465_v46, 0.0  ;;  %v1432_v53 = vmul.f32 %v465_v46, %v465_v46  ;;  %v1516_v18 = vsel %vm1285_vm2, %v1434_v62, 0.0 }
 0x102   :  { %v1511_v54 = vadd.f32 %v1510_v48, %v1509_v44  ;;  %v1328_v55 = vadd.f32 %v1327_v51, %v1326_v43  ;;  %v1870_v57 = vpop.f32.mrf.mxu0  ;;  %906 = vst.msk [vmem:[%s2683_s2 + $0xb0] sm:$0xf] %vm861_vm1, %v1786_v29 }
 0x103   :  { %883 = vst.msk [vmem:[%s2683_s2 + $0x54] sm:$0xf] %vm861_vm1, %v1763_v50  ;;  %v1512_v63 = vsel %vm1285_vm2, %v1432_v53, 0.0  ;;  %v1768_v0 = vpack.c.bf16 %v1870_v57, %v1870_v57  ;;  %v1437_v24 = vmul.f32 %v1870_v57, %v1870_v57  ;;  %v1337_v43 = vsel %vm1285_vm2, %v1870_v57, 0.0 }
 0x104   :  { %v1330_v2 = vadd.f32 %v1329_v60, %v1328_v55  ;;  %v1513_v4 = vadd.f32 %v1512_v63, %v1511_v54  ;;  %v478_v5 = vpop.f32.mrf.mxu0  ;;  %v1789_v53 = vpack.c.bf16 %v2291_v40, %v2291_v40 }
 0x105   :  { %888 = vst.msk [vmem:[%s2683_s2 + $0x68] sm:$0xf] %vm861_vm1, %v1768_v0  ;;  %v1766_v11 = vpack.c.bf16 %v478_v5, %v478_v5  ;;  %v1435_v13 = vmul.f32 %v478_v5, %v478_v5  ;;  %v1333_v22 = vsel %vm1285_vm2, %v478_v5, 0.0  ;;  %v1522_v54 = vsel %vm1285_vm2, %v1437_v24, 0.0 }
 0x106   :  { %v1515_v14 = vadd.f32 %v1514_v7, %v1513_v4  ;;  %v1332_v15 = vadd.f32 %v1331_v8, %v1330_v2  ;;  %v1871_v16 = vpop.f32.mrf.mxu0  ;;  %909 = vst.msk [vmem:[%s2683_s2 + $0xbc] sm:$0xf] %vm861_vm1, %v1789_v53  ;;  %v2429_v2 = vpop.f32.mrf.mxu1  ;;  %v1791_v53 = vpack.c.bf16 %v2349_v35, %v2349_v35 }
 0x107   :  { %886 = vst.msk [vmem:[%s2683_s2 + $0x60] sm:$0xf] %vm861_vm1, %v1766_v11  ;;  %v1769_v23 = vpack.c.bf16 %v1871_v16, %v1871_v16  ;;  %v1518_v30 = vsel %vm1285_vm2, %v1435_v13, 0.0  ;;  %v1438_v44 = vmul.f32 %v1871_v16, %v1871_v16  ;;  %v1339_v55 = vsel %vm1285_vm2, %v1871_v16, 0.0 }
 0x108   :  { %v1334_v25 = vadd.f32 %v1333_v22, %v1332_v15  ;;  %v1517_v26 = vadd.f32 %v1516_v18, %v1515_v14  ;;  %v481_v27 = vpop.f32.mrf.mxu0  ;;  %v1787_v14 = vpack.c.bf16 %v2301_v52, %v2301_v52  ;;  %911 = vst.msk [vmem:[%s2683_s2 + $0xc4] sm:$0xf] %vm861_vm1, %v1791_v53  ;;  %v1363_v53 = vsel %vm1285_vm2, %v2203_v28, 0.0 }
 0x109   :  { %889 = vst.msk [vmem:[%s2683_s2 + $0x6c] sm:$0xf] %vm861_vm1, %v1769_v23  ;;  %v1767_v32 = vpack.c.bf16 %v481_v27, %v481_v27  ;;  %v1335_v33 = vsel %vm1285_vm2, %v481_v27, 0.0  ;;  %v1436_v34 = vmul.f32 %v481_v27, %v481_v27  ;;  %v1524_v4 = vsel %vm1285_vm2, %v1438_v44, 0.0 }
 0x10a   :  { %v1519_v36 = vadd.f32 %v1518_v30, %v1517_v26  ;;  %v1336_v38 = vadd.f32 %v1335_v33, %v1334_v25  ;;  %v1874_v39 = vpop.f32.mrf.mxu0  ;;  %907 = vst.msk [vmem:[%s2683_s2 + $0xb4] sm:$0xf] %vm861_vm1, %v1787_v14  ;;  %v2449_v25 = vpop.f32.mrf.mxu1  ;;  %v1792_v30 = vpack.c.bf16 %v2313_v61, %v2313_v61  ;;  %v1795_v14 = vpack.c.bf16 %v2429_v2, %v2429_v2 }
 0x10b   :  { %887 = vst.msk [vmem:[%s2683_s2 + $0x64] sm:$0xf] %vm861_vm1, %v1767_v32  ;;  %v1520_v46 = vsel %vm1285_vm2, %v1436_v34, 0.0  ;;  %v1772_v47 = vpack.c.bf16 %v1874_v39, %v1874_v39  ;;  %v1441_v7 = vmul.f32 %v1874_v39, %v1874_v39  ;;  %v1345_v26 = vsel %vm1285_vm2, %v1874_v39, 0.0 }
 0x10c   :  { %v1338_v48 = vadd.f32 %v1337_v43, %v1336_v38  ;;  %v1521_v50 = vadd.f32 %v1520_v46, %v1519_v36  ;;  %v494_v51 = vpop.f32.mrf.mxu0  ;;  %v1790_v34 = vpack.c.bf16 %v2323_v9, %v2323_v9  ;;  %v1443_v39 = vmul.f32 %v2140_v49, %v2140_v49  ;;  %912 = vst.msk [vmem:[%s2683_s2 + $0xc8] sm:$0xf] %vm861_vm1, %v1792_v30 }
 0x10d   :  { %892 = vst.msk [vmem:[%s2683_s2 + $0x78] sm:$0xf] %vm861_vm1, %v1772_v47  ;;  %v1770_v57 = vpack.c.bf16 %v494_v51, %v494_v51  ;;  %v1439_v60 = vmul.f32 %v494_v51, %v494_v51  ;;  %v1341_v5 = vsel %vm1285_vm2, %v494_v51, 0.0  ;;  %v1530_v36 = vsel %vm1285_vm2, %v1441_v7, 0.0  ;;  %v2475_v47 = vpop.f32.mrf.mxu1  ;;  %915 = vst.msk [vmem:[%s2683_s2 + $0xd4] sm:$0xf] %vm861_vm1, %v1795_v14 }
 0x10e   :  { %v1523_v62 = vadd.f32 %v1522_v54, %v1521_v50  ;;  %v1340_v63 = vadd.f32 %v1339_v55, %v1338_v48  ;;  %v1875_v0 = vpop.f32.mrf.mxu0  ;;  %v1793_v43 = vpack.c.bf16 %v2335_v21, %v2335_v21  ;;  %910 = vst.msk [vmem:[%s2683_s2 + $0xc0] sm:$0xf] %vm861_vm1, %v1790_v34  ;;  %v1349_v50 = vsel %vm1285_vm2, %v2140_v49, 0.0 }
 0x10f   :  { %890 = vst.msk [vmem:[%s2683_s2 + $0x70] sm:$0xf] %vm861_vm1, %v1770_v57  ;;  %v1773_v6 = vpack.c.bf16 %v1875_v0, %v1875_v0  ;;  %v1526_v15 = vsel %vm1285_vm2, %v1439_v60, 0.0  ;;  %v1442_v27 = vmul.f32 %v1875_v0, %v1875_v0  ;;  %v1347_v38 = vsel %vm1285_vm2, %v1875_v0, 0.0 }
 0x110   :  { %v1342_v8 = vadd.f32 %v1341_v5, %v1340_v63  ;;  %v1525_v11 = vadd.f32 %v1524_v4, %v1523_v62  ;;  %v497_v13 = vpop.f32.mrf.mxu0  ;;  %v1444_v51 = vmul.f32 %v2169_v3, %v2169_v3  ;;  %913 = vst.msk [vmem:[%s2683_s2 + $0xcc] sm:$0xf] %vm861_vm1, %v1793_v43  ;;  %v1796_v57 = vpack.c.bf16 %v2369_v59, %v2369_v59  ;;  %v2505_v5 = vpop.f32.mrf.mxu1 }
 0x111   :  { %893 = vst.msk [vmem:[%s2683_s2 + $0x7c] sm:$0xf] %vm861_vm1, %v1773_v6  ;;  %v1771_v16 = vpack.c.bf16 %v497_v13, %v497_v13  ;;  %v1343_v18 = vsel %vm1285_vm2, %v497_v13, 0.0  ;;  %v1440_v22 = vmul.f32 %v497_v13, %v497_v13  ;;  %v1532_v48 = vsel %vm1285_vm2, %v1442_v27, 0.0 }
 0x112   :  { %v1527_v23 = vadd.f32 %v1526_v15, %v1525_v11  ;;  %v1344_v24 = vadd.f32 %v1343_v18, %v1342_v8  ;;  %v1445_v60 = vmul.f32 %v2130_v41, %v2130_v41  ;;  %v1534_v49 = vsel %vm1285_vm2, %v1443_v39, 0.0  ;;  %916 = vst.msk [vmem:[%s2683_s2 + $0xd8] sm:$0xf] %vm861_vm1, %v1796_v57 }
 0x113   :  { %891 = vst.msk [vmem:[%s2683_s2 + $0x74] sm:$0xf] %vm861_vm1, %v1771_v16  ;;  %v1528_v29 = vsel %vm1285_vm2, %v1440_v22, 0.0  ;;  %v1351_v62 = vsel %vm1285_vm2, %v2169_v3, 0.0  ;;  %v1794_v63 = vpack.c.bf16 %v2389_v17, %v2389_v17  ;;  %v1353_v3 = vsel %vm1285_vm2, %v2130_v41, 0.0 }
 0x114   :  { %v1346_v32 = vadd.f32 %v1345_v26, %v1344_v24  ;;  %v1529_v33 = vadd.f32 %v1528_v29, %v1527_v23  ;;  %v1446_v6 = vmul.f32 %v2155_v58, %v2155_v58  ;;  %v1536_v7 = vsel %vm1285_vm2, %v1444_v51, 0.0  ;;  %v2535_v24 = vpop.f32.mrf.mxu1 }
 0x115   :  { %914 = vst.msk [vmem:[%s2683_s2 + $0xd0] sm:$0xf] %vm861_vm1, %v1794_v63  ;;  %v1797_v8 = vpack.c.bf16 %v2409_v42, %v2409_v42  ;;  %v1538_v41 = vsel %vm1285_vm2, %v1445_v60, 0.0  ;;  %v1355_v15 = vsel %vm1285_vm2, %v2155_v58, 0.0  ;;  %v1447_v16 = vmul.f32 %v2191_v20, %v2191_v20 }
 0x116   :  { %v1348_v44 = vadd.f32 %v1347_v38, %v1346_v32  ;;  %v1531_v46 = vadd.f32 %v1530_v36, %v1529_v33  ;;  %v1800_v18 = vpack.c.bf16 %v2449_v25, %v2449_v25  ;;  %v1540_v58 = vsel %vm1285_vm2, %v1446_v6, 0.0 }
 0x117   :  { %917 = vst.msk [vmem:[%s2683_s2 + $0xdc] sm:$0xf] %vm861_vm1, %v1797_v8  ;;  %v1357_v26 = vsel %vm1285_vm2, %v2191_v20, 0.0  ;;  %v1448_v27 = vmul.f32 %v2213_v37, %v2213_v37  ;;  %v1798_v29 = vpack.c.bf16 %v2475_v47, %v2475_v47  ;;  %v1801_v33 = vpack.c.bf16 %v2505_v5, %v2505_v5 }
 0x118   :  { %v1533_v54 = vadd.f32 %v1532_v48, %v1531_v46  ;;  %v1350_v55 = vadd.f32 %v1349_v50, %v1348_v44  ;;  %920 = vst.msk [vmem:[%s2683_s2 + $0xe8] sm:$0xf] %vm861_vm1, %v1800_v18  ;;  %v1449_v34 = vmul.f32 %v2181_v10, %v2181_v10  ;;  %v1542_v20 = vsel %vm1285_vm2, %v1447_v16, 0.0 }
 0x119   :  { %v1359_v36 = vsel %vm1285_vm2, %v2213_v37, 0.0  ;;  %918 = vst.msk [vmem:[%s2683_s2 + $0xe0] sm:$0xf] %vm861_vm1, %v1798_v29  ;;  %v1799_v38 = vpack.c.bf16 %v2535_v24, %v2535_v24  ;;  %921 = vst.msk [vmem:[%s2683_s2 + $0xec] sm:$0xf] %vm861_vm1, %v1801_v33  ;;  %v1361_v44 = vsel %vm1285_vm2, %v2181_v10, 0.0  ;;  %v1450_v37 = vmul.f32 %v2203_v28, %v2203_v28 }
 0x11a   :  { %v1352_v0 = vadd.f32 %v1351_v62, %v1350_v55  ;;  %v1535_v4 = vadd.f32 %v1534_v49, %v1533_v54  ;;  %v1544_v46 = vsel %vm1285_vm2, %v1448_v27, 0.0  ;;  %v1546_v51 = vsel %vm1285_vm2, %v1449_v34, 0.0 }
 0x11b   :  { %919 = vst.msk [vmem:[%s2683_s2 + $0xe4] sm:$0xf] %vm861_vm1, %v1799_v38  ;;  %v1451_v10 = vmul.f32 %v2235_v56, %v2235_v56  ;;  %v1548_v57 = vsel %vm1285_vm2, %v1450_v37, 0.0  ;;  %v1365_v60 = vsel %vm1285_vm2, %v2235_v56, 0.0  ;;  %v1452_v49 = vmul.f32 %v2257_v12, %v2257_v12  ;;  %s1969_s2 = smov [#allocation2]  }
 0x11c   :  { %v1354_v11 = vadd.f32 %v1353_v3, %v1352_v0  ;;  %v1537_v13 = vadd.f32 %v1536_v7, %v1535_v4  ;;  %v1453_v0 = vmul.f32 %v2225_v45, %v2225_v45  ;;  %v1367_v4 = vsel %vm1285_vm2, %v2257_v12, 0.0  ;;  %s1608_s0 = sshll.u32 %s1969_s2, 4  ;;  %s1609_s0 = int_to_ptr.vmem [resolvable:$true] %s1608_s0 }
 0x11d   :  { %v1550_v28 = vsel %vm1285_vm2, %v1451_v10, 0.0  ;;  %v1369_v7 = vsel %vm1285_vm2, %v2225_v45, 0.0  ;;  %v1454_v56 = vmul.f32 %v2247_v1, %v2247_v1  ;;  %v1552_v8 = vsel %vm1285_vm2, %v1452_v49, 0.0  ;;  %s1947_s27 = scalar_lea.vmem %s1609_s0, 32  ;;  %p1952_p1 = scmp.lt.s32.totalorder %s1609_s0, %s1609_s0 }
 0x11e   :  { %v1539_v22 = vadd.f32 %v1538_v41, %v1537_v13  ;;  %v1356_v23 = vadd.f32 %v1355_v15, %v1354_v11  ;;  %v1554_v14 = vsel %vm1285_vm2, %v1453_v0, 0.0  ;;  %v1371_v41 = vsel %vm1285_vm2, %v2247_v1, 0.0  ;;  %p1948_p0 = scmp.ne.s32.totalorder %s1609_s0, %s1947_s27  ;;  %p1953_p2 = scmp.lt.s32.totalorder %s1947_s27, %s1947_s27 }
 0x11f   :  { %v1455_v12 = vmul.f32 %v2279_v31, %v2279_v31  ;;  %v1556_v18 = vsel %vm1285_vm2, %v1454_v56, 0.0  ;;  %v1373_v45 = vsel %vm1285_vm2, %v2279_v31, 0.0  ;;  %v1375_v27 = vsel %vm1285_vm2, %v2301_v52, 0.0 }
 0x120   :  { %v1358_v30 = vadd.f32 %v1357_v26, %v1356_v23  ;;  %v1541_v32 = vadd.f32 %v1540_v58, %v1539_v22  ;;  %v1456_v22 = vmul.f32 %v2301_v52, %v2301_v52  ;;  %v1457_v26 = vmul.f32 %v2269_v19, %v2269_v19  ;;  %p1954_p3 = por %p1953_p2, %p1952_p1 }
 0x121   :  { %v1558_v1 = vsel %vm1285_vm2, %v1455_v12, 0.0  ;;  %v1458_v31 = vmul.f32 %v2291_v40, %v2291_v40  ;;  %v1379_v38 = vsel %vm1285_vm2, %v2291_v40, 0.0  ;;  %v1459_v52 = vmul.f32 %v2323_v9, %v2323_v9 }
 0x122   :  { %v1543_v39 = vadd.f32 %v1542_v20, %v1541_v32  ;;  %v1360_v43 = vadd.f32 %v1359_v36, %v1358_v30  ;;  %v1377_v32 = vsel %vm1285_vm2, %v2269_v19, 0.0  ;;  %v1560_v33 = vsel %vm1285_vm2, %v1456_v22, 0.0  ;;  %p1955_p4 = pnand %p1954_p3, %p1948_p0 }
 0x123   :  { %v1562_v36 = vsel %vm1285_vm2, %v1457_v26, 0.0  ;;  %v1381_v19 = vsel %vm1285_vm2, %v2323_v9, 0.0  ;;  %v1460_v37 = vmul.f32 %v2349_v35, %v2349_v35  ;;  %v1566_v40 = vsel %vm1285_vm2, %v1459_v52, 0.0 }
 0x124   :  { %v1362_v48 = vadd.f32 %v1361_v44, %v1360_v43  ;;  %v1545_v50 = vadd.f32 %v1544_v46, %v1543_v39  ;;  %v1564_v44 = vsel %vm1285_vm2, %v1458_v31, 0.0  ;;  %v1462_v9 = vmul.f32 %v2335_v21, %v2335_v21 }
 0x125   :  { %v1391_v56 = vsel %vm1285_vm2, %v2429_v2, 0.0 }
 0x126   :  { %v1547_v54 = vadd.f32 %v1546_v51, %v1545_v50  ;;  %v1364_v55 = vadd.f32 %v1363_v53, %v1362_v48  ;;  %v1461_v50 = vmul.f32 %v2313_v61, %v2313_v61  ;;  %v1383_v51 = vsel %vm1285_vm2, %v2349_v35, 0.0 }
 0x127   :  { %v1463_v35 = vmul.f32 %v2389_v17, %v2389_v17 }
 0x128   :  { %v1366_v62 = vadd.f32 %v1365_v60, %v1364_v55  ;;  %v1549_v63 = vadd.f32 %v1548_v57, %v1547_v54  ;;  %v1385_v54 = vsel %vm1285_vm2, %v2313_v61, 0.0  ;;  %v1568_v55 = vsel %vm1285_vm2, %v1460_v37, 0.0 }
 0x129   :  { %v1570_v49 = vsel %vm1285_vm2, %v1461_v50, 0.0  ;;  %v1389_v61 = vsel %vm1285_vm2, %v2389_v17, 0.0  ;;  %v1466_v17 = vmul.f32 %v2409_v42, %v2409_v42 }
 0x12a   :  { %v1551_v3 = vadd.f32 %v1550_v28, %v1549_v63  ;;  %v1368_v6 = vadd.f32 %v1367_v4, %v1366_v62  ;;  %v1387_v62 = vsel %vm1285_vm2, %v2335_v21, 0.0  ;;  %v1572_v28 = vsel %vm1285_vm2, %v1462_v9, 0.0 }
 0x12b   :  { %v1464_v4 = vmul.f32 %v2429_v2, %v2429_v2  ;;  %v1574_v21 = vsel %vm1285_vm2, %v1463_v35, 0.0  ;;  %v1467_v2 = vmul.f32 %v2475_v47, %v2475_v47  ;;  %v1580_v22 = vsel %vm1285_vm2, %v1466_v17, 0.0 }
 0x12c   :  { %v1370_v11 = vadd.f32 %v1369_v7, %v1368_v6  ;;  %v1553_v13 = vadd.f32 %v1552_v8, %v1551_v3  ;;  %v1465_v7 = vmul.f32 %v2369_v59, %v2369_v59 }
 0x12e   :  { %v1555_v15 = vadd.f32 %v1554_v14, %v1553_v13  ;;  %v1372_v16 = vadd.f32 %v1371_v41, %v1370_v11  ;;  %v1393_v13 = vsel %vm1285_vm2, %v2369_v59, 0.0  ;;  %v1576_v14 = vsel %vm1285_vm2, %v1464_v4, 0.0 }
 0x12f   :  { %v1397_v59 = vsel %vm1285_vm2, %v2475_v47, 0.0  ;;  %v1470_v47 = vmul.f32 %v2505_v5, %v2505_v5 }
 0x130   :  { %v1374_v23 = vadd.f32 %v1373_v45, %v1372_v16  ;;  %v1557_v58 = vadd.f32 %v1556_v18, %v1555_v15  ;;  %v1578_v15 = vsel %vm1285_vm2, %v1465_v7, 0.0  ;;  %v1395_v16 = vsel %vm1285_vm2, %v2409_v42, 0.0 }
 0x131   :  { %v1582_v42 = vsel %vm1285_vm2, %v1467_v2, 0.0 }
 0x132   :  { %v1559_v29 = vadd.f32 %v1558_v1, %v1557_v58  ;;  %v1376_v30 = vadd.f32 %v1375_v27, %v1374_v23  ;;  %v1468_v23 = vmul.f32 %v2535_v24, %v2535_v24  ;;  %v1469_v1 = vmul.f32 %v2449_v25, %v2449_v25 }
 0x133   :  { %v1399_v27 = vsel %vm1285_vm2, %v2535_v24, 0.0  ;;  %v1588_v24 = vsel %vm1285_vm2, %v1470_v47, 0.0 }
 0x134   :  { %v1378_v34 = vadd.f32 %v1377_v32, %v1376_v30  ;;  %v1561_v20 = vadd.f32 %v1560_v33, %v1559_v29  ;;  %v1401_v32 = vsel %vm1285_vm2, %v2449_v25, 0.0  ;;  %v1584_v31 = vsel %vm1285_vm2, %v1468_v23, 0.0 }
 0x136   :  { %v1563_v39 = vadd.f32 %v1562_v36, %v1561_v20  ;;  %v1380_v43 = vadd.f32 %v1379_v38, %v1378_v34  ;;  %v1586_v20 = vsel %vm1285_vm2, %v1469_v1, 0.0  ;;  %v1403_v36 = vsel %vm1285_vm2, %v2505_v5, 0.0 }
 0x138   :  { %v1382_v46 = vadd.f32 %v1381_v19, %v1380_v43  ;;  %v1565_v48 = vadd.f32 %v1564_v44, %v1563_v39  ;;  %v923_v19 = vlaneseq }
 0x13a   :  { %v1567_v53 = vadd.f32 %v1566_v40, %v1565_v48  ;;  %v1384_v10 = vadd.f32 %v1383_v51, %v1382_v46  ;;  %v924_v40 = vshrl.u32 %v923_v19, 7 }
 0x13c   :  { %v1386_v57 = vadd.f32 %v1385_v54, %v1384_v10  ;;  %v1569_v60 = vadd.f32 %v1568_v55, %v1567_v53  ;;  %vm1596_vm3 = vcmp.eq.s32.totalorder %v924_v40, 0 }
 0x13e   :  { %v1571_v63 = vadd.f32 %v1570_v49, %v1569_v60  ;;  %v1388_v0 = vadd.f32 %v1387_v62, %v1386_v57 }
 0x140   :  { %v1390_v3 = vadd.f32 %v1389_v61, %v1388_v0  ;;  %v1573_v6 = vadd.f32 %v1572_v28, %v1571_v63 }
 0x142   :  { %v1575_v8 = vadd.f32 %v1574_v21, %v1573_v6  ;;  %v1392_v11 = vadd.f32 %v1391_v56, %v1390_v3 }
 0x144   :  { %v1394_v41 = vadd.f32 %v1393_v13, %v1392_v11  ;;  %v1577_v12 = vadd.f32 %v1576_v14, %v1575_v8 }
 0x146   :  { %v1579_v18 = vadd.f32 %v1578_v15, %v1577_v12  ;;  %v1396_v45 = vadd.f32 %v1395_v16, %v1394_v41 }
 0x148   :  { %v1398_v58 = vadd.f32 %v1397_v59, %v1396_v45  ;;  %v1581_v26 = vadd.f32 %v1580_v22, %v1579_v18 }
 0x14a   :  { %v1583_v29 = vadd.f32 %v1582_v42, %v1581_v26  ;;  %v1400_v30 = vadd.f32 %v1399_v27, %v1398_v58 }
 0x14c   :  { %v1402_v33 = vadd.f32 %v1401_v32, %v1400_v30  ;;  %v1585_v34 = vadd.f32 %v1584_v31, %v1583_v29 }
 0x14e   :  { %v1404_v38 = vadd.f32 %v1403_v36, %v1402_v33  ;;  %v1587_v52 = vadd.f32 %v1586_v20, %v1585_v34 }
 0x150   :  { %v1405_v39 = vrot.slane %v1404_v38, 4  ;;  %v1589_v43 = vadd.f32 %v1588_v24, %v1587_v52 }
 0x152   :  { %v1406_v44 = vadd.f32 %v1405_v39, %v1404_v38  ;;  %v1590_v25 = vrot.slane %v1589_v43, 4 }
 0x154   :  { %v1407_v37 = vrot.slane %v1406_v44, 2  ;;  %v1591_v46 = vadd.f32 %v1590_v25, %v1589_v43 }
 0x156   :  { %v1408_v48 = vadd.f32 %v1407_v37, %v1406_v44  ;;  %v1592_v50 = vrot.slane %v1591_v46, 2 }
 0x158   :  { %v1409_v51 = vrot.slane %v1408_v48, 1  ;;  %v1593_v53 = vadd.f32 %v1592_v50, %v1591_v46 }
 0x15a   :  { %v1594_v10 = vrot.slane %v1593_v53, 1  ;;  %v1410_v5 = vadd.f32 %v1409_v51, %v1408_v48 }
 0x15c   :  { %v1595_v54 = vadd.f32 %v1594_v10, %v1593_v53 }
 0x15e   :  { %v1597_v9 = vsel %vm1596_vm3, %v1410_v5, %v1595_v54 }
 0x15f   :  { %1599 = vst.msk [vmem:[#allocation2] sm:$0x3] %vm1598_vm4, %v1597_v9 }
 0x160   :  { %1958 = shalt.err (!%p1955_p4)
}
 0x161   :  { %1611 = dma.vmem_to_hbm [thread:$0]  %s1609_s0, 32, %s2684_s3, [#allocation3]  }
 0x162   :  { %1967 = dma.done.wait [#allocation3], 32  }
 0x163   :  { %1968 = vsyncadd [#allocation3], 4294967264 }
 0x164   :  { %1617 = vsyncpa [#allocation3], 1 }

// kernel: dcgan_discriminator_forward.4
= control target key start
LH: loop header
LB: loop body
LE: loop exit
PB: predicated region body
PF: predicated region fallthrough
CT: control target
= control target key end

     0   :  { %vm303_vm0 = vcmask 125952   ;;  %vm419_vm1 = vcmask 130048   ;;  %vm512_vm3 = vcmask 123904   ;;  %s857_s1 = inlined_call_operand.vmem [shape: bf16[128,16], index: 1, kind: input, shape index: {}]   ;;  %s858_s0 = inlined_call_operand.vmem [shape: bf16[128,128], index: 0, kind: input, shape index: {}]   ;;  %s859_s2 = inlined_call_operand.vmem [shape: bf16[128,16], index: 2, kind: output, shape index: {0}]   ;;  %s860_s3 = inlined_call_operand.vmem [shape: f32[1,2,16], index: 3, kind: output, shape index: {1}]  }
   0x1   :  { %v634_v0 = vld [vmem:[%s857_s1 + $0x38] sm:$0xff]   ;;  %v635_v1 = vld [vmem:[%s857_s1 + $0x30] sm:$0xff]   ;;  %v636_v2 = vld [vmem:[%s857_s1 + $0x28] sm:$0xff]  }
   0x2   :  { %586 = vmatprep.subr.bf16.mxu0 %v634_v0  ;;  %618 = vmatprep.subr.bf16.mxu1 %v634_v0  ;;  %v637_v3 = vld [vmem:[%s857_s1 + $0x20] sm:$0xff]   ;;  %v638_v5 = vld [vmem:[%s857_s1 + $0x18] sm:$0xff]   ;;  %v639_v7 = vld [vmem:[%s857_s1 + $0x10] sm:$0xff]  }
   0x3   :  { %587 = vmatpush3.bf16.msra.mxu0 %v634_v0  ;;  %626 = vmatpush3.bf16.msra.mxu1 %v634_v0  ;;  %v642_v4 = vld [vmem:[%s858_s0] sm:$0xff]   ;;  %v640_v8 = vld [vmem:[%s857_s1 + $0x8] sm:$0xff]   ;;  %v644_v12 = vld [vmem:[%s858_s0 + $0x10] sm:$0xff]  }
   0x4   :  { %588 = vmatprep.subr.bf16.mxu0 %v635_v1  ;;  %619 = vmatprep.subr.bf16.mxu1 %v635_v1  ;;  %v646_v6 = vld [vmem:[%s858_s0 + $0x20] sm:$0xff]   ;;  %v643_v10 = vld [vmem:[%s858_s0 + $0x8] sm:$0xff]   ;;  %v648_v13 = vld [vmem:[%s858_s0 + $0x30] sm:$0xff]  }
   0x5   :  { %602 = vmatprep.mubr.bf16.mxu0 %v642_v4  ;;  %610 = vmatprep.mubr.bf16.mxu1 %v646_v6  ;;  %v641_v9 = vld [vmem:[%s857_s1] sm:$0xff]   ;;  %v647_v11 = vld [vmem:[%s858_s0 + $0x28] sm:$0xff]   ;;  %v645_v14 = vld [vmem:[%s858_s0 + $0x18] sm:$0xff]  }
   0x6   :  { %v649_v15 = vld [vmem:[%s858_s0 + $0x38] sm:$0xff]  }
   0x7   :  { %589 = vmatpush3.bf16.msra.mxu0 %v635_v1  ;;  %627 = vmatpush3.bf16.msra.mxu1 %v635_v1 }
   0x8   :  { %590 = vmatprep.subr.bf16.mxu0 %v636_v2  ;;  %620 = vmatprep.subr.bf16.mxu1 %v636_v2 }
   0xb   :  { %591 = vmatpush3.bf16.msra.mxu0 %v636_v2  ;;  %628 = vmatpush3.bf16.msra.mxu1 %v636_v2 }
   0xc   :  { %592 = vmatprep.subr.bf16.mxu0 %v637_v3  ;;  %621 = vmatprep.subr.bf16.mxu1 %v637_v3 }
   0xf   :  { %593 = vmatpush3.bf16.msra.mxu0 %v637_v3  ;;  %629 = vmatpush3.bf16.msra.mxu1 %v637_v3 }
  0x10   :  { %594 = vmatprep.subr.bf16.mxu0 %v638_v5  ;;  %622 = vmatprep.subr.bf16.mxu1 %v638_v5 }
  0x13   :  { %595 = vmatpush3.bf16.msra.mxu0 %v638_v5  ;;  %630 = vmatpush3.bf16.msra.mxu1 %v638_v5 }
  0x14   :  { %596 = vmatprep.subr.bf16.mxu0 %v639_v7  ;;  %623 = vmatprep.subr.bf16.mxu1 %v639_v7 }
  0x17   :  { %597 = vmatpush3.bf16.msra.mxu0 %v639_v7  ;;  %631 = vmatpush3.bf16.msra.mxu1 %v639_v7 }
  0x18   :  { %598 = vmatprep.subr.bf16.mxu0 %v640_v8  ;;  %624 = vmatprep.subr.bf16.mxu1 %v640_v8 }
  0x1b   :  { %599 = vmatpush3.bf16.msra.mxu0 %v640_v8  ;;  %632 = vmatpush3.bf16.msra.mxu1 %v640_v8 }
  0x1c   :  { %600 = vmatprep.subr.bf16.mxu0 %v641_v9  ;;  %625 = vmatprep.subr.bf16.mxu1 %v641_v9 }
  0x1f   :  { %601 = vmatpush3.bf16.msra.mxu0 %v641_v9  ;;  %633 = vmatpush3.bf16.msra.mxu1 %v641_v9 }
  0x22   :  { %603 = vmatmul.mubr.bf16.vlgmr.msra.gmra.mxu0 %v643_v10  ;;  %611 = vmatmul.mubr.bf16.vlgmr.msra.gmra.mxu1 %v647_v11 }
  0x23   :  { %606 = vmatprep.mubr.bf16.mxu0 %v644_v12  ;;  %614 = vmatprep.mubr.bf16.mxu1 %v648_v13 }
  0x2a   :  { %607 = vmatmul.mubr.bf16.gmra.mxu0 %v645_v14  ;;  %615 = vmatmul.mubr.bf16.gmra.mxu1 %v649_v15 }
  0xe2   :  { %v604_v16 = vpop.f32.mrf.mxu0  ;;  %v718_v17 = vpop.f32.mrf.mxu1 }
  0xe3   :  { %v556_v18 = vpack.c.bf16 %v604_v16, %v604_v16  ;;  %v564_v19 = vpack.c.bf16 %v718_v17, %v718_v17  ;;  %v459_v28 = vmul.f32 %v604_v16, %v604_v16  ;;  %v423_v36 = vsel %vm419_vm1, %v604_v16, 0.0 }
  0xe4   :  { %v176_v20 = vpop.f32.mrf.mxu0  ;;  %v722_v21 = vpop.f32.mrf.mxu1 }
  0xe5   :  { %306 = vst.msk [vmem:[%s859_s2 + $0x8] sm:$0xf] %vm303_vm0, %v556_v18  ;;  %v554_v22 = vpack.c.bf16 %v176_v20, %v176_v20  ;;  %314 = vst.msk [vmem:[%s859_s2 + $0x28] sm:$0xf] %vm303_vm0, %v564_v19  ;;  %v562_v24 = vpack.c.bf16 %v722_v21, %v722_v21  ;;  %v457_v26 = vmul.f32 %v176_v20, %v176_v20  ;;  %v420_v32 = vsel %vm419_vm1, %v176_v20, 0.0 }
  0xe6   :  { %v605_v23 = vpop.f32.mrf.mxu0  ;;  %v734_v25 = vpop.f32.mrf.mxu1  ;;  %v476_v50 = vsel %vm419_vm1, %v459_v28, 0.0  ;;  %v465_v19 = vmul.f32 %v722_v21, %v722_v21 }
  0xe7   :  { %304 = vst.msk [vmem:[%s859_s2] sm:$0xf] %vm303_vm0, %v554_v22  ;;  %v557_v27 = vpack.c.bf16 %v605_v23, %v605_v23  ;;  %312 = vst.msk [vmem:[%s859_s2 + $0x20] sm:$0xf] %vm303_vm0, %v562_v24  ;;  %v565_v30 = vpack.c.bf16 %v734_v25, %v734_v25  ;;  %v473_v41 = vsel %vm419_vm1, %v457_v26, 0.0  ;;  %v460_v42 = vmul.f32 %v605_v23, %v605_v23 }
  0xe8   :  { %v179_v29 = vpop.f32.mrf.mxu0  ;;  %v746_v31 = vpop.f32.mrf.mxu1  ;;  %v425_v51 = vsel %vm419_vm1, %v605_v23, 0.0  ;;  %v435_v24 = vsel %vm419_vm1, %v722_v21, 0.0  ;;  %v468_v21 = vmul.f32 %v734_v25, %v734_v25 }
  0xe9   :  { %307 = vst.msk [vmem:[%s859_s2 + $0xc] sm:$0xf] %vm303_vm0, %v557_v27  ;;  %v555_v33 = vpack.c.bf16 %v179_v29, %v179_v29  ;;  %v421_v34 = vsel %vm419_vm1, %v179_v29, 0.0  ;;  %v458_v35 = vmul.f32 %v179_v29, %v179_v29  ;;  %315 = vst.msk [vmem:[%s859_s2 + $0x2c] sm:$0xf] %vm303_vm0, %v565_v30  ;;  %v563_v39 = vpack.c.bf16 %v746_v31, %v746_v31 }
  0xea   :  { %v422_v37 = vadd.f32 %v421_v34, %v420_v32  ;;  %v608_v38 = vpop.f32.mrf.mxu0  ;;  %v761_v40 = vpop.f32.mrf.mxu1  ;;  %v478_v58 = vsel %vm419_vm1, %v460_v42, 0.0  ;;  %v466_v26 = vmul.f32 %v746_v31, %v746_v31  ;;  %v467_v29 = vmul.f32 %v718_v17, %v718_v17 }
  0xeb   :  { %305 = vst.msk [vmem:[%s859_s2 + $0x4] sm:$0xf] %vm303_vm0, %v555_v33  ;;  %v474_v43 = vsel %vm419_vm1, %v458_v35, 0.0  ;;  %v560_v44 = vpack.c.bf16 %v608_v38, %v608_v38  ;;  %313 = vst.msk [vmem:[%s859_s2 + $0x24] sm:$0xf] %vm303_vm0, %v563_v39  ;;  %v568_v48 = vpack.c.bf16 %v761_v40, %v761_v40  ;;  %v463_v61 = vmul.f32 %v608_v38, %v608_v38 }
  0xec   :  { %v424_v45 = vadd.f32 %v423_v36, %v422_v37  ;;  %v475_v46 = vadd.f32 %v474_v43, %v473_v41  ;;  %v192_v47 = vpop.f32.mrf.mxu0  ;;  %v775_v49 = vpop.f32.mrf.mxu1  ;;  %v431_v7 = vsel %vm419_vm1, %v608_v38, 0.0  ;;  %v488_v30 = vsel %vm419_vm1, %v465_v19, 0.0 }
  0xed   :  { %310 = vst.msk [vmem:[%s859_s2 + $0x18] sm:$0xf] %vm303_vm0, %v560_v44  ;;  %v558_v52 = vpack.c.bf16 %v192_v47, %v192_v47  ;;  %v461_v53 = vmul.f32 %v192_v47, %v192_v47  ;;  %318 = vst.msk [vmem:[%s859_s2 + $0x38] sm:$0xf] %vm303_vm0, %v568_v48  ;;  %v427_v59 = vsel %vm419_vm1, %v192_v47, 0.0  ;;  %v566_v1 = vpack.c.bf16 %v775_v49, %v775_v49 }
  0xee   :  { %v477_v54 = vadd.f32 %v476_v50, %v475_v46  ;;  %v426_v55 = vadd.f32 %v425_v51, %v424_v45  ;;  %v609_v56 = vpop.f32.mrf.mxu0  ;;  %v617_v57 = vpop.f32.mrf.mxu1  ;;  %v484_v16 = vsel %vm419_vm1, %v463_v61, 0.0  ;;  %v437_v32 = vsel %vm419_vm1, %v746_v31, 0.0 }
  0xef   :  { %308 = vst.msk [vmem:[%s859_s2 + $0x10] sm:$0xf] %vm303_vm0, %v558_v52  ;;  %v561_v60 = vpack.c.bf16 %v609_v56, %v609_v56  ;;  %v480_v3 = vsel %vm419_vm1, %v461_v53, 0.0  ;;  %316 = vst.msk [vmem:[%s859_s2 + $0x30] sm:$0xf] %vm303_vm0, %v566_v1  ;;  %v464_v10 = vmul.f32 %v609_v56, %v609_v56  ;;  %v569_v12 = vpack.c.bf16 %v617_v57, %v617_v57 }
  0xf0   :  { %v428_v62 = vadd.f32 %v427_v59, %v426_v55  ;;  %v479_v63 = vadd.f32 %v478_v58, %v477_v54  ;;  %v195_v0 = vpop.f32.mrf.mxu0  ;;  %v227_v2 = vpop.f32.mrf.mxu1  ;;  %v433_v18 = vsel %vm419_vm1, %v609_v56, 0.0  ;;  %v439_v35 = vsel %vm419_vm1, %v718_v17, 0.0 }
  0xf1   :  { %311 = vst.msk [vmem:[%s859_s2 + $0x1c] sm:$0xf] %vm303_vm0, %v561_v60  ;;  %v559_v4 = vpack.c.bf16 %v195_v0, %v195_v0  ;;  %v429_v5 = vsel %vm419_vm1, %v195_v0, 0.0  ;;  %v462_v6 = vmul.f32 %v195_v0, %v195_v0  ;;  %v567_v13 = vpack.c.bf16 %v227_v2, %v227_v2  ;;  %319 = vst.msk [vmem:[%s859_s2 + $0x3c] sm:$0xf] %vm303_vm0, %v569_v12 }
  0xf2   :  { %v481_v8 = vadd.f32 %v480_v3, %v479_v63  ;;  %v430_v9 = vadd.f32 %v429_v5, %v428_v62  ;;  %v486_v23 = vsel %vm419_vm1, %v464_v10, 0.0  ;;  %v490_v36 = vsel %vm419_vm1, %v466_v26, 0.0 }
  0xf3   :  { %309 = vst.msk [vmem:[%s859_s2 + $0x14] sm:$0xf] %vm303_vm0, %v559_v4  ;;  %v482_v11 = vsel %vm419_vm1, %v462_v6, 0.0  ;;  %317 = vst.msk [vmem:[%s859_s2 + $0x34] sm:$0xf] %vm303_vm0, %v567_v13  ;;  %v492_v39 = vsel %vm419_vm1, %v467_v29, 0.0  ;;  %v469_v31 = vmul.f32 %v775_v49, %v775_v49  ;;  %v470_v45 = vmul.f32 %v227_v2, %v227_v2 }
  0xf4   :  { %v432_v14 = vadd.f32 %v431_v7, %v430_v9  ;;  %v483_v15 = vadd.f32 %v482_v11, %v481_v8  ;;  %v441_v41 = vsel %vm419_vm1, %v734_v25, 0.0  ;;  %v494_v44 = vsel %vm419_vm1, %v468_v21, 0.0 }
  0xf5   :  { %v443_v17 = vsel %vm419_vm1, %v775_v49, 0.0  ;;  %v471_v48 = vmul.f32 %v761_v40, %v761_v40  ;;  %v496_v50 = vsel %vm419_vm1, %v469_v31, 0.0  ;;  %v445_v25 = vsel %vm419_vm1, %v227_v2, 0.0 }
  0xf6   :  { %v434_v20 = vadd.f32 %v433_v18, %v432_v14  ;;  %v485_v22 = vadd.f32 %v484_v16, %v483_v15  ;;  %v447_v53 = vsel %vm419_vm1, %v761_v40, 0.0  ;;  %v498_v54 = vsel %vm419_vm1, %v470_v45, 0.0 }
  0xf7   :  { %v500_v49 = vsel %vm419_vm1, %v471_v48, 0.0  ;;  %v321_v61 = vlaneseq }
  0xf8   :  { %v487_v27 = vadd.f32 %v486_v23, %v485_v22  ;;  %v436_v28 = vadd.f32 %v435_v24, %v434_v20 }
  0xf9   :  { %v322_v2 = vshrl.u32 %v321_v61, 7 }
  0xfa   :  { %v438_v33 = vadd.f32 %v437_v32, %v436_v28  ;;  %v489_v34 = vadd.f32 %v488_v30, %v487_v27 }
  0xfb   :  { %vm510_vm2 = vcmp.eq.s32.totalorder %v322_v2, 0 }
  0xfc   :  { %v440_v37 = vadd.f32 %v439_v35, %v438_v33  ;;  %v491_v38 = vadd.f32 %v490_v36, %v489_v34 }
  0xfe   :  { %v493_v42 = vadd.f32 %v492_v39, %v491_v38  ;;  %v442_v43 = vadd.f32 %v441_v41, %v440_v37 }
 0x100   :  { %v444_v46 = vadd.f32 %v443_v17, %v442_v43  ;;  %v495_v47 = vadd.f32 %v494_v44, %v493_v42 }
 0x102   :  { %v497_v51 = vadd.f32 %v496_v50, %v495_v47  ;;  %v446_v52 = vadd.f32 %v445_v25, %v444_v46 }
 0x104   :  { %v448_v55 = vadd.f32 %v447_v53, %v446_v52  ;;  %v499_v56 = vadd.f32 %v498_v54, %v497_v51 }
 0x106   :  { %v451_v57 = vrot.slane %v448_v55, 4  ;;  %v501_v58 = vadd.f32 %v500_v49, %v499_v56 }
 0x108   :  { %v452_v59 = vadd.f32 %v451_v57, %v448_v55  ;;  %v504_v60 = vrot.slane %v501_v58, 4 }
 0x10a   :  { %v453_v62 = vrot.slane %v452_v59, 2  ;;  %v505_v63 = vadd.f32 %v504_v60, %v501_v58 }
 0x10c   :  { %v454_v0 = vadd.f32 %v453_v62, %v452_v59  ;;  %v506_v1 = vrot.slane %v505_v63, 2 }
 0x10e   :  { %v455_v3 = vrot.slane %v454_v0, 1  ;;  %v507_v4 = vadd.f32 %v506_v1, %v505_v63 }
 0x110   :  { %v508_v5 = vrot.slane %v507_v4, 1  ;;  %v456_v40 = vadd.f32 %v455_v3, %v454_v0 }
 0x112   :  { %v509_v6 = vadd.f32 %v508_v5, %v507_v4 }
 0x114   :  { %v511_v7 = vsel %vm510_vm2, %v456_v40, %v509_v6 }
 0x115   :  { %513 = vst.msk [vmem:[%s860_s3] sm:$0x3] %vm512_vm3, %v511_v7 }

// kernel: dcgan_discriminator_forward.5
= control target key start
LH: loop header
LB: loop body
LE: loop exit
PB: predicated region body
PF: predicated region fallthrough
CT: control target
= control target key end

     0   :  { %v237_v20 = vlaneseq  ;;  %vm231_vm0 = vcmask 257024   ;;  %vm263_vm1 = vcmask 261120   ;;  %vm296_vm4 = vcmask 254976   ;;  %s507_s1 = inlined_call_operand.vmem [shape: bf16[256,32], index: 1, kind: input, shape index: {}]   ;;  %s508_s0 = inlined_call_operand.vmem [shape: bf16[32,256], index: 0, kind: input, shape index: {}]   ;;  %s509_s2 = inlined_call_operand.vmem [shape: bf16[32,32], index: 2, kind: output, shape index: {0}]   ;;  %s510_s3 = inlined_call_operand.vmem [shape: f32[1,2,32], index: 3, kind: output, shape index: {1}]  }
   0x1   :  { %v378_v0 = vld [vmem:[%s507_s1 + $0x78] sm:$0xff]   ;;  %v380_v2 = vld [vmem:[%s507_s1 + $0x70] sm:$0xff]   ;;  %v382_v4 = vld [vmem:[%s507_s1 + $0x68] sm:$0xff]  }
   0x2   :  { %v379_v1 = vld [vmem:[%s507_s1 + $0x38] sm:$0xff]   ;;  %334 = vmatprep.subr.bf16.mxu0 %v378_v0  ;;  %362 = vmatprep.subr.bf16.mxu1 %v378_v0  ;;  %v381_v3 = vld [vmem:[%s507_s1 + $0x30] sm:$0xff]   ;;  %v383_v5 = vld [vmem:[%s507_s1 + $0x28] sm:$0xff]   ;;  %v238_v21 = vshrl.u32 %v237_v20, 7 }
   0x3   :  { %335 = vmatpush3.bf16.msra.mxu0 %v379_v1  ;;  %370 = vmatpush3.bf16.msra.mxu1 %v379_v1  ;;  %v384_v6 = vld [vmem:[%s507_s1 + $0x60] sm:$0xff]   ;;  %v386_v8 = vld [vmem:[%s507_s1 + $0x58] sm:$0xff]   ;;  %v388_v10 = vld [vmem:[%s507_s1 + $0x50] sm:$0xff]  }
   0x4   :  { %336 = vmatprep.subr.bf16.mxu0 %v380_v2  ;;  %363 = vmatprep.subr.bf16.mxu1 %v380_v2  ;;  %v385_v7 = vld [vmem:[%s507_s1 + $0x20] sm:$0xff]   ;;  %v387_v9 = vld [vmem:[%s507_s1 + $0x18] sm:$0xff]   ;;  %v389_v13 = vld [vmem:[%s507_s1 + $0x10] sm:$0xff]   ;;  %v241_v28 = vadd.s32 24, %v238_v21  ;;  %vm294_vm3 = vcmp.eq.s32.totalorder %v238_v21, 0 }
   0x5   :  { %v396_v11 = vld [vmem:[%s508_s0 + $0x4] ss:$8 sps:$4 sm:$0xff]   ;;  %v399_v12 = vld [vmem:[%s508_s0 + $0x14] ss:$8 sps:$4 sm:$0xff]   ;;  %v394_v18 = vld [vmem:[%s508_s0] ss:$8 sps:$4 sm:$0xff]  }
   0x6   :  { %v390_v14 = vld [vmem:[%s507_s1 + $0x48] sm:$0xff]   ;;  %198 = vmatprep.mubr.bf16.mxu0 %v396_v11  ;;  %206 = vmatprep.mubr.bf16.mxu1 %v399_v12  ;;  %v392_v16 = vld [vmem:[%s507_s1 + $0x40] sm:$0xff]   ;;  %v397_v19 = vld [vmem:[%s508_s0 + $0x10] ss:$8 sps:$4 sm:$0xff]   ;;  %vm250_vm2 = vcmp.lt.s32.totalorder %v241_v28, 30 }
   0x7   :  { %337 = vmatpush3.bf16.msra.mxu0 %v381_v3  ;;  %371 = vmatpush3.bf16.msra.mxu1 %v381_v3  ;;  %v391_v15 = vld [vmem:[%s507_s1 + $0x8] sm:$0xff]   ;;  %v393_v17 = vld [vmem:[%s507_s1] sm:$0xff]  }
   0x8   :  { %338 = vmatprep.subr.bf16.mxu0 %v382_v4  ;;  %364 = vmatprep.subr.bf16.mxu1 %v382_v4 }
   0xb   :  { %339 = vmatpush3.bf16.msra.mxu0 %v383_v5  ;;  %372 = vmatpush3.bf16.msra.mxu1 %v383_v5 }
   0xc   :  { %340 = vmatprep.subr.bf16.mxu0 %v384_v6  ;;  %365 = vmatprep.subr.bf16.mxu1 %v384_v6 }
   0xf   :  { %341 = vmatpush3.bf16.msra.mxu0 %v385_v7  ;;  %373 = vmatpush3.bf16.msra.mxu1 %v385_v7 }
  0x10   :  { %342 = vmatprep.subr.bf16.mxu0 %v386_v8  ;;  %366 = vmatprep.subr.bf16.mxu1 %v386_v8 }
  0x13   :  { %343 = vmatpush3.bf16.msra.mxu0 %v387_v9  ;;  %374 = vmatpush3.bf16.msra.mxu1 %v387_v9 }
  0x14   :  { %344 = vmatprep.subr.bf16.mxu0 %v388_v10  ;;  %367 = vmatprep.subr.bf16.mxu1 %v388_v10 }
  0x17   :  { %345 = vmatpush3.bf16.msra.mxu0 %v389_v13  ;;  %375 = vmatpush3.bf16.msra.mxu1 %v389_v13 }
  0x18   :  { %346 = vmatprep.subr.bf16.mxu0 %v390_v14  ;;  %368 = vmatprep.subr.bf16.mxu1 %v390_v14 }
  0x1b   :  { %347 = vmatpush3.bf16.msra.mxu0 %v391_v15  ;;  %376 = vmatpush3.bf16.msra.mxu1 %v391_v15 }
  0x1c   :  { %348 = vmatprep.subr.bf16.mxu0 %v392_v16  ;;  %369 = vmatprep.subr.bf16.mxu1 %v392_v16 }
  0x1f   :  { %349 = vmatpush3.bf16.msra.mxu0 %v393_v17  ;;  %377 = vmatpush3.bf16.msra.mxu1 %v393_v17 }
  0x22   :  { %199 = vmatmul.mubr.bf16.vlgmr.msra.gmra.mxu0 %v394_v18  ;;  %207 = vmatmul.mubr.bf16.vlgmr.msra.gmra.mxu1 %v397_v19 }
  0xe2   :  { %v350_v22 = vpop.f32.mrf.mxu0  ;;  %v356_v23 = vpop.f32.mrf.mxu1 }
  0xe4   :  { %v351_v24 = vpop.f32.mrf.mxu0  ;;  %v357_v25 = vpop.f32.mrf.mxu1 }
  0xe5   :  { %v352_v26 = vadd.f32 %v351_v24, %v350_v22  ;;  %v358_v27 = vadd.f32 %v357_v25, %v356_v23 }
  0xe6   :  { %v353_v29 = vpop.f32.mrf.mxu0  ;;  %v359_v30 = vpop.f32.mrf.mxu1 }
  0xe7   :  { %v330_v31 = vpack.c.bf16 %v352_v26, %v352_v26  ;;  %v332_v32 = vpack.c.bf16 %v358_v27, %v358_v27  ;;  %v277_v35 = vmul.f32 %v352_v26, %v352_v26  ;;  %v264_v38 = vsel %vm263_vm1, %v352_v26, 0.0 }
  0xe8   :  { %v354_v33 = vpop.f32.mrf.mxu0  ;;  %v360_v34 = vpop.f32.mrf.mxu1  ;;  %v279_v39 = vmul.f32 %v358_v27, %v358_v27  ;;  %v267_v47 = vsel %vm263_vm1, %v358_v27, 0.0 }
  0xe9   :  { %232 = vst.msk [vmem:[%s509_s2] sm:$0xf] %vm231_vm0, %v330_v31  ;;  %234 = vst.msk [vmem:[%s509_s2 + $0x8] sm:$0xf] %vm231_vm0, %v332_v32  ;;  %v355_v36 = vadd.f32 %v354_v33, %v353_v29  ;;  %v361_v37 = vadd.f32 %v360_v34, %v359_v30  ;;  %v281_v46 = vsel %vm263_vm1, %v277_v35, 0.0 }
  0xea   :  { %v284_v52 = vsel %vm263_vm1, %v279_v39, 0.0 }
  0xeb   :  { %v331_v40 = vpack.c.bf16 %v355_v36, %v355_v36  ;;  %v265_v41 = vsel %vm263_vm1, %v355_v36, 0.0  ;;  %v278_v42 = vmul.f32 %v355_v36, %v355_v36  ;;  %v333_v43 = vpack.c.bf16 %v361_v37, %v361_v37 }
  0xec   :  { %v266_v44 = vadd.f32 %v265_v41, %v264_v38  ;;  %v262_v45 = vsel %vm250_vm2, %v361_v37, 0.0 }
  0xed   :  { %233 = vst.msk [vmem:[%s509_s2 + $0x4] sm:$0xf] %vm231_vm0, %v331_v40  ;;  %v282_v48 = vsel %vm263_vm1, %v278_v42, 0.0  ;;  %235 = vst.msk [vmem:[%s509_s2 + $0xc] sm:$0xf] %vm231_vm0, %v333_v43  ;;  %v280_v49 = vmul.f32 %v262_v45, %v262_v45  ;;  %v269_v53 = vsel %vm263_vm1, %v262_v45, 0.0 }
  0xee   :  { %v283_v50 = vadd.f32 %v282_v48, %v281_v46  ;;  %v268_v51 = vadd.f32 %v267_v47, %v266_v44 }
  0xef   :  { %v286_v56 = vsel %vm263_vm1, %v280_v49, 0.0 }
  0xf0   :  { %v270_v54 = vadd.f32 %v269_v53, %v268_v51  ;;  %v285_v55 = vadd.f32 %v284_v52, %v283_v50 }
  0xf2   :  { %v271_v57 = vrot.slane %v270_v54, 4  ;;  %v287_v58 = vadd.f32 %v286_v56, %v285_v55 }
  0xf4   :  { %v272_v59 = vadd.f32 %v271_v57, %v270_v54  ;;  %v288_v60 = vrot.slane %v287_v58, 4 }
  0xf6   :  { %v273_v61 = vrot.slane %v272_v59, 2  ;;  %v289_v62 = vadd.f32 %v288_v60, %v287_v58 }
  0xf8   :  { %v274_v63 = vadd.f32 %v273_v61, %v272_v59  ;;  %v290_v0 = vrot.slane %v289_v62, 2 }
  0xfa   :  { %v275_v1 = vrot.slane %v274_v63, 1  ;;  %v291_v2 = vadd.f32 %v290_v0, %v289_v62 }
  0xfc   :  { %v292_v3 = vrot.slane %v291_v2, 1  ;;  %v276_v4 = vadd.f32 %v275_v1, %v274_v63 }
  0xfe   :  { %v293_v5 = vadd.f32 %v292_v3, %v291_v2 }
 0x100   :  { %v295_v6 = vsel %vm294_vm3, %v276_v4, %v293_v5 }
 0x101   :  { %297 = vst.msk [vmem:[%s510_s3] sm:$0x3] %vm296_vm4, %v295_v6 }

</bundles_post_ra>
